<compile_context>
chip_gen: v7x
topology: tpu7x:2x2x1
jax: 0.10.0
libtpu: 0.0.40
codegen_flags: <defaults>
</compile_context>

<pallas_src>
import functools

import jax
import jax.numpy as jnp
from jax import lax
from jax.experimental import pallas as pl
from jax.experimental.pallas import tpu as pltpu

# ----- model hyper-parameters (small, consistent with the module) -----
FEA = 32                 # feaSize
DK = 8                   # per-head dim dk
NH = 4                   # multiNum
D = DK * NH              # = 32 (== feaSize here)
HID = 4 * FEA            # FFN hidden = 128
NEG_FILL = float(-2 ** 15 + 1)   # -32767.0, as in masked_fill
LN_EPS = 1e-5


# ---------------- small helpers (pure jnp/lax, usable in-kernel) ----------------
def _layernorm(x, w, b):
    mu = jnp.mean(x, axis=-1, keepdims=True)
    var = jnp.mean((x - mu) ** 2, axis=-1, keepdims=True)
    return (x - mu) * lax.rsqrt(var + LN_EPS) * w + b


def _gelu(x):
    # exact (erf-based) GELU, matching nn.GELU default
    return 0.5 * x * (1.0 + lax.erf(x * 0.7071067811865475))


# --------------------------- Pallas kernel ---------------------------
@functools.lru_cache(maxsize=None)
def _make_kernel(B, L, fused):
    BL = B * L
    inv_sqrt_dk = 1.0 / (DK ** 0.5)

    def kernel(qx_ref, kx_ref, vx_ref, pre_ref, mask_ref,
               w_all_ref, w12_ref, vec_ref, out_ref, scores_ref):
        # ---- unpack the (8,128) bias / LayerNorm slab ----
        vec = vec_ref[...]
        b_qkvo = vec[0:1, :]                       # bq | bk | bv | bo  (1,128)
        b1 = vec[1:2, :]                           # FFN bias 1          (1,128)
        b2 = vec[2:3, 0:FEA]
        ln1w = vec[2:3, FEA:2 * FEA]
        ln1b = vec[2:3, 2 * FEA:3 * FEA]
        ln2w = vec[2:3, 3 * FEA:4 * FEA]
        ln2b = vec[3:4, 0:FEA]

        vx2 = vx_ref[...]                          # (BL, C) residual input for FFN
        w_all = w_all_ref[...]                     # (C, 128) = [WQ|WK|WV|WO]

        # ---- Q/K/V projections ----
        if fused:
            # one (BL,32)@(32,128) MXU push; the trailing WO columns are unused.
            proj = jnp.dot(qx_ref[...], w_all,
                           preferred_element_type=jnp.float32) + b_qkvo
            q2 = proj[:, 0:D]
            k2 = proj[:, D:2 * D]
            v2 = proj[:, 2 * D:3 * D]
        else:
            # true cross-attention path: separate projections.
            q2 = jnp.dot(qx_ref[...], w_all[:, 0:D],
                         preferred_element_type=jnp.float32) + b_qkvo[:, 0:D]
            k2 = jnp.dot(kx_ref[...], w_all[:, D:2 * D],
                         preferred_element_type=jnp.float32) + b_qkvo[:, D:2 * D]
            v2 = jnp.dot(vx2, w_all[:, 2 * D:3 * D],
                         preferred_element_type=jnp.float32) + b_qkvo[:, 2 * D:3 * D]

        # ---- head-batched layout: (BL, D) -> (NH*B, L, DK), head-major ----
        def to_heads(x2):
            x3 = x2.reshape(B, L, D)
            return jnp.concatenate(
                [x3[:, :, h * DK:(h + 1) * DK] for h in range(NH)], axis=0)

        qh = to_heads(q2)
        kh = to_heads(k2)
        vh = to_heads(v2)

        # ---- attention scores (single batched einsum over all heads) ----
        sc = jnp.einsum('nld,nmd->nlm', qh, kh,
                        preferred_element_type=jnp.float32) * inv_sqrt_dk
        sc = sc + pre_ref[...]                             # Realformer residual scores
        sc = jnp.where(mask_ref[...] == 0.0, NEG_FILL, sc)  # masked_fill (hoisted cmp)
        scores_ref[...] = sc                               # single (NH*B, L, L) store

        # ---- softmax (f32 stats, EUP reciprocal) ----
        m = jnp.max(sc, axis=-1, keepdims=True)
        e = jnp.exp(sc - m)
        al = e * pl.reciprocal(jnp.sum(e, axis=-1, keepdims=True), approx=True)

        # ---- weighted values + single K=32 output projection ----
        zh = jnp.einsum('nlm,nmd->nld', al, vh,
                        preferred_element_type=jnp.float32)        # (NH*B, L, DK)
        z2 = jnp.concatenate(
            [zh[h * B:(h + 1) * B].reshape(BL, DK) for h in range(NH)],
            axis=-1)                                               # (BL, D), head-major cols
        z = jnp.dot(z2, w_all[:, 3 * D:4 * D],
                    preferred_element_type=jnp.float32) + b_qkvo[:, 3 * D:4 * D]

        # ---- FFN (post-LN); residual on vx; dropout = identity (inference) ----
        zn = _layernorm(vx2 + z, ln1w, ln1b)
        h1 = _gelu(jnp.dot(zn, w12_ref[0],
                           preferred_element_type=jnp.float32) + b1)
        # w12_ref[1] holds W2^T (C, HID); contract over the shared HID axis.
        ffn = jnp.einsum('nk,mk->nm', h1, w12_ref[1],
                         preferred_element_type=jnp.float32) + b2
        out_ref[...] = _layernorm(zn + ffn, ln2w, ln2b)            # (BL, C)

    return kernel


# --------------------------- wrapper ---------------------------
def pack_params(p):
    """Pack the 16 per-layer tensors into 3 DMA-friendly buffers."""
    (wq, bq, wk, bk, wv, bv, wo, bo, ln1w, ln1b, w1, b1, w2, b2, ln2w, ln2b) = p
    w_all = jnp.concatenate([wq, wk, wv, wo], axis=1)        # (C, 4*D) = (32, 128)
    w12 = jnp.stack([w1, w2.T], axis=0)                      # (2, C, HID) = (2, 32, 128)
    vec = jnp.zeros((8, 128), jnp.float32)
    vec = vec.at[0, 0:D].set(bq)
    vec = vec.at[0, D:2 * D].set(bk)
    vec = vec.at[0, 2 * D:3 * D].set(bv)
    vec = vec.at[0, 3 * D:4 * D].set(bo)
    vec = vec.at[1, 0:HID].set(b1)
    vec = vec.at[2, 0:FEA].set(b2)
    vec = vec.at[2, FEA:2 * FEA].set(ln1w)
    vec = vec.at[2, 2 * FEA:3 * FEA].set(ln1b)
    vec = vec.at[2, 3 * FEA:4 * FEA].set(ln2w)
    vec = vec.at[3, 0:FEA].set(ln2b)
    return (w_all, w12, vec)


def transformer_realformer_fwd(qx, kx, vx, preScores, maskPAD, packed,
                               shared_qkv=None):
    """Transformer_Realformer.forward((qx, kx, vx, preScores, maskPAD))."""
    B, L, C = qx.shape
    assert C == FEA
    w_all, w12, vec = packed
    if shared_qkv is None:
        shared_qkv = (qx is kx) and (kx is vx)
    if preScores is None:
        preScores = jnp.zeros((B, NH, L, L), jnp.float32)

    # wrapper-side layout plumbing (free vs. in-kernel relayouts):
    qx2 = qx.reshape(B * L, C)
    kx2 = kx.reshape(B * L, C)
    vx2 = vx.reshape(B * L, C)
    pre_hb = jnp.transpose(preScores, (1, 0, 2, 3)).reshape(NH * B, L, L)
    mask_hb = jnp.tile((maskPAD != 0).astype(jnp.float32), (NH, 1, 1))   # (NH*B, L, L)

    kernel = _make_kernel(B, L, bool(shared_qkv))
    im2 = lambda i: (0, 0)
    im3 = lambda i: (0, 0, 0)
    in_specs = [
        pl.BlockSpec((B * L, C), im2),          # qx  (BL, C)
        pl.BlockSpec((B * L, C), im2),          # kx  (BL, C)
        pl.BlockSpec((B * L, C), im2),          # vx  (BL, C)
        pl.BlockSpec((NH * B, L, L), im3),      # preScores, head-major
        pl.BlockSpec((NH * B, L, L), im3),      # mask (float 0/1), head-major
        pl.BlockSpec(w_all.shape, im2),         # [WQ|WK|WV|WO]  (32, 128)
        pl.BlockSpec(w12.shape, im3),           # [W1, W2^T]     (2, 32, 128)
        pl.BlockSpec(vec.shape, im2),           # biases / LN params (8, 128)
    ]
    out_specs = [
        pl.BlockSpec((B * L, C), im2),          # activations (BL, C)
        pl.BlockSpec((NH * B, L, L), im3),      # masked attention scores
    ]
    out_shape = (
        jax.ShapeDtypeStruct((B * L, C), jnp.float32),
        jax.ShapeDtypeStruct((NH * B, L, L), jnp.float32),
    )
    out2d, sc_hb = pl.pallas_call(
        kernel,
        grid=(1,),
        in_specs=in_specs,
        out_specs=out_specs,
        out_shape=out_shape,
        compiler_params=pltpu.CompilerParams(dimension_semantics=("arbitrary",)),
    )(qx2, kx2, vx2, pre_hb, mask_hb, w_all, w12, vec)

    x = out2d.reshape(B, L, C)
    scores = jnp.transpose(sc_hb.reshape(NH, B, L, L), (1, 0, 2, 3))
    return x, x, x, scores, maskPAD


# ------------------------- parameter creation -------------------------
def init_params(key):
    """Weights ~ trunc-normal(std=0.02) as in _reset_parameters; small nonzero
    biases are used (instead of the module's zeros) so the packing / bias paths
    are actually exercised by the correctness check."""
    ks = jax.random.split(key, 12)
    tn = lambda k, shp: jax.random.truncated_normal(k, -2.0, 2.0, shp, jnp.float32) * 0.02
    small = lambda k, shp: jax.random.normal(k, shp, jnp.float32) * 0.02
    wq = tn(ks[0], (FEA, D)); wk = tn(ks[1], (FEA, D)); wv = tn(ks[2], (FEA, D))
    wo = tn(ks[3], (D, FEA))
    w1 = tn(ks[4], (FEA, HID)); w2 = tn(ks[5], (HID, FEA))
    bq = small(ks[6], (D,)); bk = small(ks[7], (D,)); bv = small(ks[8], (D,))
    bo = small(ks[9], (FEA,))
    b1 = small(ks[10], (HID,)); b2 = small(ks[11], (FEA,))
    ln1w = jnp.ones((FEA,), jnp.float32); ln1b = jnp.zeros((FEA,), jnp.float32)
    ln2w = jnp.ones((FEA,), jnp.float32); ln2b = jnp.zeros((FEA,), jnp.float32)
    return (wq, bq, wk, bk, wv, bv, wo, bo, ln1w, ln1b, w1, b1, w2, b2, ln2w, ln2b)


# ----------------------- pure-JAX reference (check) -----------------------
def _ref_forward(qx, kx, vx, preScores, maskPAD, p):
    (wq, bq, wk, bk, wv, bv, wo, bo, ln1w, ln1b, w1, b1, w2, b2, ln2w, ln2b) = p
    B, L, C = qx.shape
    q = (qx @ wq + bq).reshape(B, L, NH, DK).transpose(0, 2, 1, 3)
    k = (kx @ wk + bk).reshape(B, L, NH, DK).transpose(0, 2, 1, 3)
    v = (vx @ wv + bv).reshape(B, L, NH, DK).transpose(0, 2, 1, 3)
    sc = jnp.einsum('bhld,bhmd->bhlm', q, k) / (DK ** 0.5)
    if preScores is not None:
        sc = sc + preScores
    sc = jnp.where((maskPAD == 0)[:, None, :, :], NEG_FILL, sc)
    al = jax.nn.softmax(sc, axis=-1)
    z = jnp.einsum('bhlm,bhmd->bhld', al, v).transpose(0, 2, 1, 3).reshape(B, L, D)
    z = z @ wo + bo
    zn = _layernorm(vx + z, ln1w, ln1b)
    ffn = _gelu(zn @ w1 + b1) @ w2 + b2
    x = _layernorm(zn + ffn, ln2w, ln2b)
    return x, x, x, sc, maskPAD


# ------------------------------- main -------------------------------
if __name__ == "__main__":
    B, L = 2, 16
    key = jax.random.PRNGKey(0)
    k0, k1, k2 = jax.random.split(key, 3)
    x = jax.random.normal(k0, (B, L, FEA), jnp.float32)

    # maskPAD: (B, L, L); last 3 positions of batch element 1 are padding
    valid = jnp.ones((B, L), jnp.float32).at[1, L - 3:].set(0.0)
    maskPAD = (valid[:, :, None] * valid[:, None, :]).astype(jnp.int32)

    p1 = init_params(k1)
    p2 = init_params(k2)
    packed1 = pack_params(p1)
    packed2 = pack_params(p2)

    # first application: preScores=None path (treated as zeros)
    x1, _, _, sc1, _ = transformer_realformer_fwd(x, x, x, None, maskPAD, packed1)
    # second application chained Realformer-style: previous scores fed as preScores
    x2, _, _, sc2, _ = transformer_realformer_fwd(x1, x1, x1, sc1, maskPAD, packed2)
    jax.block_until_ready((x2, sc2))

    # correctness check against pure-JAX reference (both sides run at default
    # bf16 MXU precision; tolerance absorbs that + the approx softmax reciprocal)
    rx1, _, _, rsc1, _ = _ref_forward(x, x, x, None, maskPAD, p1)
    rx2, _, _, rsc2, _ = _ref_forward(rx1, rx1, rx1, rsc1, maskPAD, p2)
    assert jnp.allclose(x1, rx1, rtol=5e-3, atol=5e-3), "layer-1 output mismatch"
    assert jnp.allclose(sc1, rsc1, rtol=5e-3, atol=5e-3), "layer-1 scores mismatch"
    assert jnp.allclose(x2, rx2, rtol=5e-3, atol=5e-3), "layer-2 output mismatch"
    assert jnp.allclose(sc2, rsc2, rtol=5e-3, atol=5e-3), "layer-2 scores mismatch"

    print("KERNEL_OK")
</pallas_src>

<mosaic_0001>
module attributes {stable_mosaic.version = 11 : i64} {
  func.func @kernel(%arg0: i32, %arg1: memref<32x32xf32, #tpu.memory_space<vmem>>, %arg2: memref<32x32xf32, #tpu.memory_space<vmem>>, %arg3: memref<32x32xf32, #tpu.memory_space<vmem>>, %arg4: memref<8x16x16xf32, #tpu.memory_space<vmem>>, %arg5: memref<8x16x16xf32, #tpu.memory_space<vmem>>, %arg6: memref<32x128xf32, #tpu.memory_space<vmem>>, %arg7: memref<2x32x128xf32, #tpu.memory_space<vmem>>, %arg8: memref<8x128xf32, #tpu.memory_space<vmem>>, %arg9: memref<32x32xf32, #tpu.memory_space<vmem>>, %arg10: memref<8x16x16xf32, #tpu.memory_space<vmem>>) attributes {dimension_semantics = [#tpu.dimension_semantics<arbitrary>], iteration_bounds = array<i64: 1>, scalar_prefetch = 0 : i64, scratch_operands = 0 : i64, tpu.core_type = #tpu.core_type<tc>, window_params = [{pipeline_mode = #tpu.pipeline_mode<synchronous>, transform_indices = @transform_0, window_bounds = array<i64: 32, 32>}, {pipeline_mode = #tpu.pipeline_mode<synchronous>, transform_indices = @transform_1, window_bounds = array<i64: 32, 32>}, {pipeline_mode = #tpu.pipeline_mode<synchronous>, transform_indices = @transform_2, window_bounds = array<i64: 32, 32>}, {pipeline_mode = #tpu.pipeline_mode<synchronous>, transform_indices = @transform_3, window_bounds = array<i64: 8, 16, 16>}, {pipeline_mode = #tpu.pipeline_mode<synchronous>, transform_indices = @transform_4, window_bounds = array<i64: 8, 16, 16>}, {pipeline_mode = #tpu.pipeline_mode<synchronous>, transform_indices = @transform_5, window_bounds = array<i64: 32, 128>}, {pipeline_mode = #tpu.pipeline_mode<synchronous>, transform_indices = @transform_6, window_bounds = array<i64: 2, 32, 128>}, {pipeline_mode = #tpu.pipeline_mode<synchronous>, transform_indices = @transform_7, window_bounds = array<i64: 8, 128>}, {pipeline_mode = #tpu.pipeline_mode<synchronous>, transform_indices = @transform_8, window_bounds = array<i64: 32, 32>}, {pipeline_mode = #tpu.pipeline_mode<synchronous>, transform_indices = @transform_9, window_bounds = array<i64: 8, 16, 16>}]} {
    %c0 = arith.constant 0 : index
    %c0_0 = arith.constant 0 : index
    %0 = vector.load %arg8[%c0, %c0_0] : memref<8x128xf32, #tpu.memory_space<vmem>>, vector<8x128xf32>
    %1 = vector.extract_strided_slice %0 {offsets = [0, 0], sizes = [1, 128], strides = [1, 1]} : vector<8x128xf32> to vector<1x128xf32>
    %2 = vector.extract_strided_slice %0 {offsets = [1, 0], sizes = [1, 128], strides = [1, 1]} : vector<8x128xf32> to vector<1x128xf32>
    %3 = vector.extract_strided_slice %0 {offsets = [2, 0], sizes = [1, 32], strides = [1, 1]} : vector<8x128xf32> to vector<1x32xf32>
    %4 = vector.extract_strided_slice %0 {offsets = [2, 32], sizes = [1, 32], strides = [1, 1]} : vector<8x128xf32> to vector<1x32xf32>
    %5 = vector.extract_strided_slice %0 {offsets = [2, 64], sizes = [1, 32], strides = [1, 1]} : vector<8x128xf32> to vector<1x32xf32>
    %6 = vector.extract_strided_slice %0 {offsets = [2, 96], sizes = [1, 32], strides = [1, 1]} : vector<8x128xf32> to vector<1x32xf32>
    %7 = vector.extract_strided_slice %0 {offsets = [3, 0], sizes = [1, 32], strides = [1, 1]} : vector<8x128xf32> to vector<1x32xf32>
    %c0_1 = arith.constant 0 : index
    %c0_2 = arith.constant 0 : index
    %8 = vector.load %arg3[%c0_1, %c0_2] : memref<32x32xf32, #tpu.memory_space<vmem>>, vector<32x32xf32>
    %c0_3 = arith.constant 0 : index
    %c0_4 = arith.constant 0 : index
    %9 = vector.load %arg6[%c0_3, %c0_4] : memref<32x128xf32, #tpu.memory_space<vmem>>, vector<32x128xf32>
    %c0_5 = arith.constant 0 : index
    %c0_6 = arith.constant 0 : index
    %10 = vector.load %arg1[%c0_5, %c0_6] : memref<32x32xf32, #tpu.memory_space<vmem>>, vector<32x32xf32>
    %cst = arith.constant dense<0.000000e+00> : vector<32x128xf32>
    %11 = tpu.matmul %10, %9, %cst {dimension_numbers = #tpu.dot_dimension_numbers<[1], [0], [0], [1], [0, 0, 1, 1], [], []>} : vector<32x32xf32>, vector<32x128xf32>, vector<32x128xf32> -> vector<32x128xf32>
    %12 = vector.broadcast %1 : vector<1x128xf32> to vector<32x128xf32>
    %13 = arith.addf %11, %12 : vector<32x128xf32>
    %14 = vector.extract_strided_slice %13 {offsets = [0, 0], sizes = [32, 32], strides = [1, 1]} : vector<32x128xf32> to vector<32x32xf32>
    %15 = vector.extract_strided_slice %13 {offsets = [0, 32], sizes = [32, 32], strides = [1, 1]} : vector<32x128xf32> to vector<32x32xf32>
    %16 = vector.extract_strided_slice %13 {offsets = [0, 64], sizes = [32, 32], strides = [1, 1]} : vector<32x128xf32> to vector<32x32xf32>
    %17 = vector.shape_cast %14 : vector<32x32xf32> to vector<2x16x32xf32>
    %18 = vector.extract_strided_slice %17 {offsets = [0, 0, 0], sizes = [2, 16, 8], strides = [1, 1, 1]} : vector<2x16x32xf32> to vector<2x16x8xf32>
    %19 = vector.extract_strided_slice %17 {offsets = [0, 0, 8], sizes = [2, 16, 8], strides = [1, 1, 1]} : vector<2x16x32xf32> to vector<2x16x8xf32>
    %20 = vector.extract_strided_slice %17 {offsets = [0, 0, 16], sizes = [2, 16, 8], strides = [1, 1, 1]} : vector<2x16x32xf32> to vector<2x16x8xf32>
    %21 = vector.extract_strided_slice %17 {offsets = [0, 0, 24], sizes = [2, 16, 8], strides = [1, 1, 1]} : vector<2x16x32xf32> to vector<2x16x8xf32>
    %22 = tpu.concatenate %18, %19, %20, %21 in 0 : vector<2x16x8xf32>, vector<2x16x8xf32>, vector<2x16x8xf32>, vector<2x16x8xf32> -> vector<8x16x8xf32>
    %23 = vector.shape_cast %15 : vector<32x32xf32> to vector<2x16x32xf32>
    %24 = vector.extract_strided_slice %23 {offsets = [0, 0, 0], sizes = [2, 16, 8], strides = [1, 1, 1]} : vector<2x16x32xf32> to vector<2x16x8xf32>
    %25 = vector.extract_strided_slice %23 {offsets = [0, 0, 8], sizes = [2, 16, 8], strides = [1, 1, 1]} : vector<2x16x32xf32> to vector<2x16x8xf32>
    %26 = vector.extract_strided_slice %23 {offsets = [0, 0, 16], sizes = [2, 16, 8], strides = [1, 1, 1]} : vector<2x16x32xf32> to vector<2x16x8xf32>
    %27 = vector.extract_strided_slice %23 {offsets = [0, 0, 24], sizes = [2, 16, 8], strides = [1, 1, 1]} : vector<2x16x32xf32> to vector<2x16x8xf32>
    %28 = tpu.concatenate %24, %25, %26, %27 in 0 : vector<2x16x8xf32>, vector<2x16x8xf32>, vector<2x16x8xf32>, vector<2x16x8xf32> -> vector<8x16x8xf32>
    %29 = vector.shape_cast %16 : vector<32x32xf32> to vector<2x16x32xf32>
    %30 = vector.extract_strided_slice %29 {offsets = [0, 0, 0], sizes = [2, 16, 8], strides = [1, 1, 1]} : vector<2x16x32xf32> to vector<2x16x8xf32>
    %31 = vector.extract_strided_slice %29 {offsets = [0, 0, 8], sizes = [2, 16, 8], strides = [1, 1, 1]} : vector<2x16x32xf32> to vector<2x16x8xf32>
    %32 = vector.extract_strided_slice %29 {offsets = [0, 0, 16], sizes = [2, 16, 8], strides = [1, 1, 1]} : vector<2x16x32xf32> to vector<2x16x8xf32>
    %33 = vector.extract_strided_slice %29 {offsets = [0, 0, 24], sizes = [2, 16, 8], strides = [1, 1, 1]} : vector<2x16x32xf32> to vector<2x16x8xf32>
    %34 = tpu.concatenate %30, %31, %32, %33 in 0 : vector<2x16x8xf32>, vector<2x16x8xf32>, vector<2x16x8xf32>, vector<2x16x8xf32> -> vector<8x16x8xf32>
    "tpu.trace_start"() <{level = 10 : i32, message = "nld,nmd->nlm"}> : () -> ()
    %cst_7 = arith.constant dense<0.000000e+00> : vector<8x16x16xf32>
    %35 = tpu.matmul %22, %28, %cst_7 {dimension_numbers = #tpu.dot_dimension_numbers<[2], [2], [1], [1], [0, 0, 0, 1, 1, 1], [0], [0]>} : vector<8x16x8xf32>, vector<8x16x8xf32>, vector<8x16x16xf32> -> vector<8x16x16xf32>
    "tpu.trace_stop"() : () -> ()
    %cst_8 = arith.constant 0.353553385 : f32
    %36 = vector.broadcast %cst_8 : f32 to vector<8x16x16xf32>
    %37 = arith.mulf %35, %36 : vector<8x16x16xf32>
    %c0_9 = arith.constant 0 : index
    %c0_10 = arith.constant 0 : index
    %c0_11 = arith.constant 0 : index
    %38 = vector.load %arg4[%c0_9, %c0_10, %c0_11] : memref<8x16x16xf32, #tpu.memory_space<vmem>>, vector<8x16x16xf32>
    %39 = arith.addf %37, %38 : vector<8x16x16xf32>
    %c0_12 = arith.constant 0 : index
    %c0_13 = arith.constant 0 : index
    %c0_14 = arith.constant 0 : index
    %40 = vector.load %arg5[%c0_12, %c0_13, %c0_14] : memref<8x16x16xf32, #tpu.memory_space<vmem>>, vector<8x16x16xf32>
    %cst_15 = arith.constant 0.000000e+00 : f32
    %41 = vector.broadcast %cst_15 : f32 to vector<8x16x16xf32>
    %42 = arith.cmpf oeq, %40, %41 : vector<8x16x16xf32>
    %cst_16 = arith.constant -3.276700e+04 : f32
    %43 = vector.broadcast %cst_16 : f32 to vector<8x16x16xf32>
    %44 = arith.select %42, %43, %39 : vector<8x16x16xi1>, vector<8x16x16xf32>
    %c0_17 = arith.constant 0 : index
    %c0_18 = arith.constant 0 : index
    %c0_19 = arith.constant 0 : index
    %45 = vector.load %arg10[%c0_17, %c0_18, %c0_19] : memref<8x16x16xf32, #tpu.memory_space<vmem>>, vector<8x16x16xf32>
    tpu.vector_store %arg10[%c0_17, %c0_18, %c0_19], %44 {strides = array<i32>} : memref<8x16x16xf32, #tpu.memory_space<vmem>>, vector<8x16x16xf32>,
    %cst_20 = arith.constant dense<0xFF800000> : vector<8x16xf32>
    %46 = vector.multi_reduction <maximumf>, %44, %cst_20 [2] : vector<8x16x16xf32> to vector<8x16xf32>
    %47 = vector.shape_cast %46 : vector<8x16xf32> to vector<8x16x1xf32>
    %48 = vector.broadcast %47 : vector<8x16x1xf32> to vector<8x16x16xf32>
    %49 = arith.subf %44, %48 : vector<8x16x16xf32>
    %50 = math.exp %49 : vector<8x16x16xf32>
    %cst_21 = arith.constant dense<0.000000e+00> : vector<8x16xf32>
    %51 = vector.multi_reduction <add>, %50, %cst_21 [2] : vector<8x16x16xf32> to vector<8x16xf32>
    %52 = vector.shape_cast %51 : vector<8x16xf32> to vector<8x16x1xf32>
    %53 = tpu.reciprocal %52 {approx = true} : vector<8x16x1xf32> -> vector<8x16x1xf32>
    %54 = vector.broadcast %53 : vector<8x16x1xf32> to vector<8x16x16xf32>
    %55 = arith.mulf %50, %54 : vector<8x16x16xf32>
    "tpu.trace_start"() <{level = 10 : i32, message = "nlm,nmd->nld"}> : () -> ()
    %cst_22 = arith.constant dense<0.000000e+00> : vector<8x16x8xf32>
    %56 = tpu.matmul %55, %34, %cst_22 {dimension_numbers = #tpu.dot_dimension_numbers<[2], [1], [1], [2], [0, 0, 0, 1, 1, 2], [0], [0]>} : vector<8x16x16xf32>, vector<8x16x8xf32>, vector<8x16x8xf32> -> vector<8x16x8xf32>
    "tpu.trace_stop"() : () -> ()
    %57 = vector.extract_strided_slice %56 {offsets = [0, 0, 0], sizes = [2, 16, 8], strides = [1, 1, 1]} : vector<8x16x8xf32> to vector<2x16x8xf32>
    %58 = vector.shape_cast %57 : vector<2x16x8xf32> to vector<32x8xf32>
    %59 = vector.extract_strided_slice %56 {offsets = [2, 0, 0], sizes = [2, 16, 8], strides = [1, 1, 1]} : vector<8x16x8xf32> to vector<2x16x8xf32>
    %60 = vector.shape_cast %59 : vector<2x16x8xf32> to vector<32x8xf32>
    %61 = vector.extract_strided_slice %56 {offsets = [4, 0, 0], sizes = [2, 16, 8], strides = [1, 1, 1]} : vector<8x16x8xf32> to vector<2x16x8xf32>
    %62 = vector.shape_cast %61 : vector<2x16x8xf32> to vector<32x8xf32>
    %63 = vector.extract_strided_slice %56 {offsets = [6, 0, 0], sizes = [2, 16, 8], strides = [1, 1, 1]} : vector<8x16x8xf32> to vector<2x16x8xf32>
    %64 = vector.shape_cast %63 : vector<2x16x8xf32> to vector<32x8xf32>
    %65 = tpu.concatenate %58, %60, %62, %64 in 1 : vector<32x8xf32>, vector<32x8xf32>, vector<32x8xf32>, vector<32x8xf32> -> vector<32x32xf32>
    %66 = vector.extract_strided_slice %9 {offsets = [0, 96], sizes = [32, 32], strides = [1, 1]} : vector<32x128xf32> to vector<32x32xf32>
    %cst_23 = arith.constant dense<0.000000e+00> : vector<32x32xf32>
    %67 = tpu.matmul %65, %66, %cst_23 {dimension_numbers = #tpu.dot_dimension_numbers<[1], [0], [0], [1], [0, 0, 1, 1], [], []>} : vector<32x32xf32>, vector<32x32xf32>, vector<32x32xf32> -> vector<32x32xf32>
    %68 = vector.extract_strided_slice %1 {offsets = [0, 96], sizes = [1, 32], strides = [1, 1]} : vector<1x128xf32> to vector<1x32xf32>
    %69 = vector.broadcast %68 : vector<1x32xf32> to vector<32x32xf32>
    %70 = arith.addf %67, %69 : vector<32x32xf32>
    %71 = arith.addf %8, %70 : vector<32x32xf32>
    %cst_24 = arith.constant dense<0.000000e+00> : vector<32xf32>
    %72 = vector.multi_reduction <add>, %71, %cst_24 [1] : vector<32x32xf32> to vector<32xf32>
    %73 = vector.shape_cast %72 : vector<32xf32> to vector<32x1xf32>
    %cst_25 = arith.constant 3.200000e+01 : f32
    %74 = vector.broadcast %cst_25 : f32 to vector<32x1xf32>
    %75 = arith.divf %73, %74 : vector<32x1xf32>
    %76 = vector.broadcast %75 : vector<32x1xf32> to vector<32x32xf32>
    %77 = arith.subf %71, %76 : vector<32x32xf32>
    %78 = arith.mulf %77, %77 : vector<32x32xf32>
    %cst_26 = arith.constant dense<0.000000e+00> : vector<32xf32>
    %79 = vector.multi_reduction <add>, %78, %cst_26 [1] : vector<32x32xf32> to vector<32xf32>
    %80 = vector.shape_cast %79 : vector<32xf32> to vector<32x1xf32>
    %cst_27 = arith.constant 3.200000e+01 : f32
    %81 = vector.broadcast %cst_27 : f32 to vector<32x1xf32>
    %82 = arith.divf %80, %81 : vector<32x1xf32>
    %83 = vector.broadcast %75 : vector<32x1xf32> to vector<32x32xf32>
    %84 = arith.subf %71, %83 : vector<32x32xf32>
    %cst_28 = arith.constant 9.99999974E-6 : f32
    %85 = vector.broadcast %cst_28 : f32 to vector<32x1xf32>
    %86 = arith.addf %82, %85 : vector<32x1xf32>
    %87 = math.rsqrt %86 : vector<32x1xf32>
    %88 = vector.broadcast %87 : vector<32x1xf32> to vector<32x32xf32>
    %89 = arith.mulf %84, %88 : vector<32x32xf32>
    %90 = vector.broadcast %4 : vector<1x32xf32> to vector<32x32xf32>
    %91 = arith.mulf %89, %90 : vector<32x32xf32>
    %92 = vector.broadcast %5 : vector<1x32xf32> to vector<32x32xf32>
    %93 = arith.addf %91, %92 : vector<32x32xf32>
    %c0_29 = arith.constant 0 : index
    %c0_30 = arith.constant 0 : index
    %c0_31 = arith.constant 0 : index
    %94 = vector.load %arg7[%c0_29, %c0_30, %c0_31] : memref<2x32x128xf32, #tpu.memory_space<vmem>>, vector<1x32x128xf32>
    %95 = vector.shape_cast %94 : vector<1x32x128xf32> to vector<32x128xf32>
    %cst_32 = arith.constant dense<0.000000e+00> : vector<32x128xf32>
    %96 = tpu.matmul %93, %95, %cst_32 {dimension_numbers = #tpu.dot_dimension_numbers<[1], [0], [0], [1], [0, 0, 1, 1], [], []>} : vector<32x32xf32>, vector<32x128xf32>, vector<32x128xf32> -> vector<32x128xf32>
    %97 = vector.broadcast %2 : vector<1x128xf32> to vector<32x128xf32>
    %98 = arith.addf %96, %97 : vector<32x128xf32>
    %cst_33 = arith.constant 5.000000e-01 : f32
    %99 = vector.broadcast %cst_33 : f32 to vector<32x128xf32>
    %100 = arith.mulf %99, %98 : vector<32x128xf32>
    %cst_34 = arith.constant 0.707106769 : f32
    %101 = vector.broadcast %cst_34 : f32 to vector<32x128xf32>
    %102 = arith.mulf %98, %101 : vector<32x128xf32>
    %103 = math.erf %102 : vector<32x128xf32>
    %cst_35 = arith.constant 1.000000e+00 : f32
    %104 = vector.broadcast %cst_35 : f32 to vector<32x128xf32>
    %105 = arith.addf %104, %103 : vector<32x128xf32>
    %106 = arith.mulf %100, %105 : vector<32x128xf32>
    %c1 = arith.constant 1 : index
    %c0_36 = arith.constant 0 : index
    %c0_37 = arith.constant 0 : index
    %107 = vector.load %arg7[%c1, %c0_36, %c0_37] : memref<2x32x128xf32, #tpu.memory_space<vmem>>, vector<1x32x128xf32>
    %108 = vector.shape_cast %107 : vector<1x32x128xf32> to vector<32x128xf32>
    "tpu.trace_start"() <{level = 10 : i32, message = "nk,mk->nm"}> : () -> ()
    %cst_38 = arith.constant dense<0.000000e+00> : vector<32x32xf32>
    %109 = tpu.matmul %106, %108, %cst_38 {dimension_numbers = #tpu.dot_dimension_numbers<[1], [1], [0], [0], [0, 0, 1, 0], [], []>} : vector<32x128xf32>, vector<32x128xf32>, vector<32x32xf32> -> vector<32x32xf32>
    "tpu.trace_stop"() : () -> ()
    %110 = vector.broadcast %3 : vector<1x32xf32> to vector<32x32xf32>
    %111 = arith.addf %109, %110 : vector<32x32xf32>
    %112 = arith.addf %93, %111 : vector<32x32xf32>
    %cst_39 = arith.constant dense<0.000000e+00> : vector<32xf32>
    %113 = vector.multi_reduction <add>, %112, %cst_39 [1] : vector<32x32xf32> to vector<32xf32>
    %114 = vector.shape_cast %113 : vector<32xf32> to vector<32x1xf32>
    %cst_40 = arith.constant 3.200000e+01 : f32
    %115 = vector.broadcast %cst_40 : f32 to vector<32x1xf32>
    %116 = arith.divf %114, %115 : vector<32x1xf32>
    %117 = vector.broadcast %116 : vector<32x1xf32> to vector<32x32xf32>
    %118 = arith.subf %112, %117 : vector<32x32xf32>
    %119 = arith.mulf %118, %118 : vector<32x32xf32>
    %cst_41 = arith.constant dense<0.000000e+00> : vector<32xf32>
    %120 = vector.multi_reduction <add>, %119, %cst_41 [1] : vector<32x32xf32> to vector<32xf32>
    %121 = vector.shape_cast %120 : vector<32xf32> to vector<32x1xf32>
    %cst_42 = arith.constant 3.200000e+01 : f32
    %122 = vector.broadcast %cst_42 : f32 to vector<32x1xf32>
    %123 = arith.divf %121, %122 : vector<32x1xf32>
    %124 = vector.broadcast %116 : vector<32x1xf32> to vector<32x32xf32>
    %125 = arith.subf %112, %124 : vector<32x32xf32>
    %cst_43 = arith.constant 9.99999974E-6 : f32
    %126 = vector.broadcast %cst_43 : f32 to vector<32x1xf32>
    %127 = arith.addf %123, %126 : vector<32x1xf32>
    %128 = math.rsqrt %127 : vector<32x1xf32>
    %129 = vector.broadcast %128 : vector<32x1xf32> to vector<32x32xf32>
    %130 = arith.mulf %125, %129 : vector<32x32xf32>
    %131 = vector.broadcast %6 : vector<1x32xf32> to vector<32x32xf32>
    %132 = arith.mulf %130, %131 : vector<32x32xf32>
    %133 = vector.broadcast %7 : vector<1x32xf32> to vector<32x32xf32>
    %134 = arith.addf %132, %133 : vector<32x32xf32>
    %c0_44 = arith.constant 0 : index
    %c0_45 = arith.constant 0 : index
    %135 = vector.load %arg9[%c0_44, %c0_45] : memref<32x32xf32, #tpu.memory_space<vmem>>, vector<32x32xf32>
    tpu.vector_store %arg9[%c0_44, %c0_45], %134 {strides = array<i32>} : memref<32x32xf32, #tpu.memory_space<vmem>>, vector<32x32xf32>,
    return
  }
  func.func @transform_0(%arg0: i32) -> (i32, i32) {
    %c0_i32 = arith.constant 0 : i32
    %c0_i32_0 = arith.constant 0 : i32
    %c0_i32_1 = arith.constant 0 : i32
    return %c0_i32, %c0_i32_0 : i32, i32
  }
  func.func @transform_1(%arg0: i32) -> (i32, i32) {
    %c0_i32 = arith.constant 0 : i32
    %c0_i32_0 = arith.constant 0 : i32
    %c0_i32_1 = arith.constant 0 : i32
    return %c0_i32, %c0_i32_0 : i32, i32
  }
  func.func @transform_2(%arg0: i32) -> (i32, i32) {
    %c0_i32 = arith.constant 0 : i32
    %c0_i32_0 = arith.constant 0 : i32
    %c0_i32_1 = arith.constant 0 : i32
    return %c0_i32, %c0_i32_0 : i32, i32
  }
  func.func @transform_3(%arg0: i32) -> (i32, i32, i32) {
    %c0_i32 = arith.constant 0 : i32
    %c0_i32_0 = arith.constant 0 : i32
    %c0_i32_1 = arith.constant 0 : i32
    %c0_i32_2 = arith.constant 0 : i32
    return %c0_i32, %c0_i32_0, %c0_i32_1 : i32, i32, i32
  }
  func.func @transform_4(%arg0: i32) -> (i32, i32, i32) {
    %c0_i32 = arith.constant 0 : i32
    %c0_i32_0 = arith.constant 0 : i32
    %c0_i32_1 = arith.constant 0 : i32
    %c0_i32_2 = arith.constant 0 : i32
    return %c0_i32, %c0_i32_0, %c0_i32_1 : i32, i32, i32
  }
  func.func @transform_5(%arg0: i32) -> (i32, i32) {
    %c0_i32 = arith.constant 0 : i32
    %c0_i32_0 = arith.constant 0 : i32
    %c0_i32_1 = arith.constant 0 : i32
    return %c0_i32, %c0_i32_0 : i32, i32
  }
  func.func @transform_6(%arg0: i32) -> (i32, i32, i32) {
    %c0_i32 = arith.constant 0 : i32
    %c0_i32_0 = arith.constant 0 : i32
    %c0_i32_1 = arith.constant 0 : i32
    %c0_i32_2 = arith.constant 0 : i32
    return %c0_i32, %c0_i32_0, %c0_i32_1 : i32, i32, i32
  }
  func.func @transform_7(%arg0: i32) -> (i32, i32) {
    %c0_i32 = arith.constant 0 : i32
    %c0_i32_0 = arith.constant 0 : i32
    %c0_i32_1 = arith.constant 0 : i32
    return %c0_i32, %c0_i32_0 : i32, i32
  }
  func.func @transform_8(%arg0: i32) -> (i32, i32) {
    %c0_i32 = arith.constant 0 : i32
    %c0_i32_0 = arith.constant 0 : i32
    %c0_i32_1 = arith.constant 0 : i32
    return %c0_i32, %c0_i32_0 : i32, i32
  }
  func.func @transform_9(%arg0: i32) -> (i32, i32, i32) {
    %c0_i32 = arith.constant 0 : i32
    %c0_i32_0 = arith.constant 0 : i32
    %c0_i32_1 = arith.constant 0 : i32
    %c0_i32_2 = arith.constant 0 : i32
    return %c0_i32, %c0_i32_0, %c0_i32_1 : i32, i32, i32
  }
}

</mosaic_0001>

<bundles_post_ra>
// kernel: tpu_custom_call.1
= control target key start
LH: loop header
LB: loop body
LE: loop exit
PB: predicated region body
PF: predicated region fallthrough
CT: control target
= control target key end

     0   :  { %15 = vsyncpa [#allocation3], 0  ;;  %s4063_s0 = inlined_call_operand.hbm [shape: f32[32,32], index: 0, kind: input, shape index: {}]   ;;  %s4064_s1 = inlined_call_operand.hbm [shape: f32[32,32], index: 1, kind: input, shape index: {}]   ;;  %s4065_s2 = inlined_call_operand.hbm [shape: f32[32,32], index: 2, kind: input, shape index: {}]   ;;  %s4066_s3 = inlined_call_operand.hbm [shape: f32[8,16,16], index: 3, kind: input, shape index: {}]   ;;  %s4067_s4 = inlined_call_operand.hbm [shape: f32[8,16,16], index: 4, kind: input, shape index: {}]   ;;  %s4068_s5 = inlined_call_operand.hbm [shape: f32[32,128], index: 5, kind: input, shape index: {}]   ;;  %s4069_s6 = inlined_call_operand.hbm [shape: f32[2,32,128], index: 6, kind: input, shape index: {}]   ;;  %s4070_s7 = inlined_call_operand.vmem [shape: f32[8,128], index: 7, kind: input, shape index: {}]   ;;  %s4071_s8 = inlined_call_operand.hbm [shape: f32[32,32], index: 8, kind: output, shape index: {0}]   ;;  %s4072_s9 = inlined_call_operand.hbm [shape: f32[8,16,16], index: 9, kind: output, shape index: {1}]  }
   0x1   :  { %16 = vsyncpa [#allocation6], 0 }
   0x2   :  { %17 = vsyncpa [#allocation9], 0 }
   0x3   :  { %18 = vsyncpa [#allocation12], 0 }
   0x4   :  { %19 = vsyncpa [#allocation4], 0 }
   0x5   :  { %20 = vsyncpa [#allocation16], 0  ;;  %s3379_s30 = smov [#allocation5]   ;;  %s3380_s11 = smov [#allocation8]  }
   0x6   :  { %s38_s10 = sshll.u32 %s3379_s30, 4  ;;  %s62_s12 = sshll.u32 %s3380_s11, 4  ;;  %s39_s10 = int_to_ptr.vmem [resolvable:$true] %s38_s10  ;;  %s3448_s12 = int_to_ptr.vmem [resolvable:$true] %s62_s12 }
   0x7   :  { %s3169_s15 = scalar_lea.hbm %s4064_s1, 512 }
   0x8   :  { %p3170_p0 = scmp.ne.s32.totalorder %s4064_s1, %s3169_s15  ;;  %p3173_p1 = scmp.lt.u32.totalorder %s3169_s15, %s4064_s1 }
   0xa   :  { %p3175_p2 = pnand %p3173_p1, %p3170_p0 }
   0xc   :  { %3178 = shalt.err (!%p3175_p2)
}
   0xd   :  { %s3179_s20 = scalar_lea.vmem %s39_s10, 512  ;;  %p3184_p4 = scmp.lt.s32.totalorder %s39_s10, %s39_s10 }
   0xe   :  { %p3180_p3 = scmp.ne.s32.totalorder %s39_s10, %s3179_s20  ;;  %p3185_p5 = scmp.lt.s32.totalorder %s3179_s20, %s3179_s20 }
  0x10   :  { %p3186_p6 = por %p3185_p5, %p3184_p4 }
  0x12   :  { %p3187_p7 = pnand %p3186_p6, %p3180_p3 }
  0x14   :  { %3190 = shalt.err (!%p3187_p7)
}
  0x15   :  { %s3381_s21 = smov 128   ;;  %s3382_s22 = smov 8  }
  0x16   :  { %44 = dma.hbm_to_vmem [thread:$0]  %s4064_s1, 512, %s39_s10, [#allocation6], %s3381_s21, %s3381_s21, %s3382_s22  }
  0x17   :  { %s3191_s27 = scalar_lea.hbm %s4066_s3, 2048 }
  0x18   :  { %p3192_p8 = scmp.ne.s32.totalorder %s4066_s3, %s3191_s27  ;;  %p3195_p9 = scmp.lt.u32.totalorder %s3191_s27, %s4066_s3 }
  0x1a   :  { %p3197_p10 = pnand %p3195_p9, %p3192_p8 }
  0x1c   :  { %3200 = shalt.err (!%p3197_p10)
}
  0x1d   :  { %s3201_s13 = scalar_lea.vmem %s3448_s12, 2048  ;;  %p3206_p12 = scmp.lt.s32.totalorder %s3448_s12, %s3448_s12 }
  0x1e   :  { %p3202_p11 = scmp.ne.s32.totalorder %s3448_s12, %s3201_s13  ;;  %p3207_p13 = scmp.lt.s32.totalorder %s3201_s13, %s3201_s13 }
  0x20   :  { %p3208_p0 = por %p3207_p13, %p3206_p12 }
  0x22   :  { %p3209_p1 = pnand %p3208_p0, %p3202_p11 }
  0x24   :  { %3212 = shalt.err (!%p3209_p1)
}
  0x25   :  { %68 = dma.hbm_to_vmem [thread:$0]  %s4066_s3, 2048, %s3448_s12, [#allocation9], %s3381_s21, %s3381_s21, %s3382_s22  }
  0x26   :  { %s3383_s14 = smov [#allocation11]   ;;  %s3384_s16 = smov [#allocation2]  }
  0x27   :  { %s86_s15 = sshll.u32 %s3383_s14, 4  ;;  %s26_s17 = sshll.u32 %s3384_s16, 4  ;;  %s87_s15 = int_to_ptr.vmem [resolvable:$true] %s86_s15  ;;  %s3485_s17 = int_to_ptr.vmem [resolvable:$true] %s26_s17 }
  0x28   :  { %s3213_s20 = scalar_lea.hbm %s4068_s5, 512 }
  0x29   :  { %p3214_p2 = scmp.ne.s32.totalorder %s4068_s5, %s3213_s20  ;;  %p3217_p3 = scmp.lt.u32.totalorder %s3213_s20, %s4068_s5 }
  0x2b   :  { %p3219_p4 = pnand %p3217_p3, %p3214_p2 }
  0x2d   :  { %3222 = shalt.err (!%p3219_p4)
}
  0x2e   :  { %s3223_s3 = scalar_lea.vmem %s87_s15, 512  ;;  %p3228_p6 = scmp.lt.s32.totalorder %s87_s15, %s87_s15 }
  0x2f   :  { %p3224_p5 = scmp.ne.s32.totalorder %s87_s15, %s3223_s3  ;;  %p3229_p7 = scmp.lt.s32.totalorder %s3223_s3, %s3223_s3 }
  0x31   :  { %p3230_p8 = por %p3229_p7, %p3228_p6 }
  0x33   :  { %p3231_p9 = pnand %p3230_p8, %p3224_p5 }
  0x35   :  { %3234 = shalt.err (!%p3231_p9)
}
  0x36   :  { %92 = dma.hbm_to_vmem [thread:$0]  %s4068_s5, 512, %s87_s15, [#allocation12], %s3381_s21, %s3381_s21, %s3382_s22  }
  0x37   :  { %s3235_s30 = scalar_lea.hbm %s4063_s0, 512 }
  0x38   :  { %p3236_p10 = scmp.ne.s32.totalorder %s4063_s0, %s3235_s30  ;;  %p3239_p11 = scmp.lt.u32.totalorder %s3235_s30, %s4063_s0 }
  0x3a   :  { %p3241_p12 = pnand %p3239_p11, %p3236_p10 }
  0x3c   :  { %3244 = shalt.err (!%p3241_p12)
}
  0x3d   :  { %s3245_s14 = scalar_lea.vmem %s3485_s17, 512  ;;  %p3250_p0 = scmp.lt.s32.totalorder %s3485_s17, %s3485_s17 }
  0x3e   :  { %p3246_p13 = scmp.ne.s32.totalorder %s3485_s17, %s3245_s14  ;;  %p3251_p1 = scmp.lt.s32.totalorder %s3245_s14, %s3245_s14 }
  0x40   :  { %p3252_p2 = por %p3251_p1, %p3250_p0 }
  0x42   :  { %p3253_p3 = pnand %p3252_p2, %p3246_p13 }
  0x44   :  { %3256 = shalt.err (!%p3253_p3)
}
  0x45   :  { %32 = dma.hbm_to_vmem [thread:$0]  %s4063_s0, 512, %s3485_s17, [#allocation3], %s3381_s21, %s3381_s21, %s3382_s22  }
  0x46   :  { %s3385_s16 = smov [#allocation7]   ;;  %s3386_s19 = smov [#allocation10]  }
  0x47   :  { %s50_s18 = sshll.u32 %s3385_s16, 4  ;;  %s74_s20 = sshll.u32 %s3386_s19, 4  ;;  %s51_s18 = int_to_ptr.vmem [resolvable:$true] %s50_s18  ;;  %s3522_s20 = int_to_ptr.vmem [resolvable:$true] %s74_s20 }
  0x48   :  { %s3257_s25 = scalar_lea.hbm %s4065_s2, 512 }
  0x49   :  { %p3258_p4 = scmp.ne.s32.totalorder %s4065_s2, %s3257_s25  ;;  %p3261_p5 = scmp.lt.u32.totalorder %s3257_s25, %s4065_s2 }
  0x4b   :  { %p3263_p6 = pnand %p3261_p5, %p3258_p4 }
  0x4d   :  { %3266 = shalt.err (!%p3263_p6)
}
  0x4e   :  { %s3267_s0 = scalar_lea.vmem %s51_s18, 512  ;;  %p3272_p8 = scmp.lt.s32.totalorder %s51_s18, %s51_s18 }
  0x4f   :  { %p3268_p7 = scmp.ne.s32.totalorder %s51_s18, %s3267_s0  ;;  %p3273_p9 = scmp.lt.s32.totalorder %s3267_s0, %s3267_s0 }
  0x51   :  { %p3274_p10 = por %p3273_p9, %p3272_p8 }
  0x53   :  { %p3275_p11 = pnand %p3274_p10, %p3268_p7 }
  0x55   :  { %3278 = shalt.err (!%p3275_p11)
}
  0x56   :  { %56 = dma.hbm_to_vmem [thread:$0]  %s4065_s2, 512, %s51_s18, [#allocation6], %s3381_s21, %s3381_s21, %s3382_s22  }
  0x57   :  { %s3279_s11 = scalar_lea.hbm %s4067_s4, 2048 }
  0x58   :  { %p3280_p12 = scmp.ne.s32.totalorder %s4067_s4, %s3279_s11  ;;  %p3283_p13 = scmp.lt.u32.totalorder %s3279_s11, %s4067_s4 }
  0x5a   :  { %p3285_p0 = pnand %p3283_p13, %p3280_p12 }
  0x5c   :  { %3288 = shalt.err (!%p3285_p0)
}
  0x5d   :  { %s3289_s5 = scalar_lea.vmem %s3522_s20, 2048  ;;  %p3294_p2 = scmp.lt.s32.totalorder %s3522_s20, %s3522_s20 }
  0x5e   :  { %p3290_p1 = scmp.ne.s32.totalorder %s3522_s20, %s3289_s5  ;;  %p3295_p3 = scmp.lt.s32.totalorder %s3289_s5, %s3289_s5 }
  0x60   :  { %p3296_p4 = por %p3295_p3, %p3294_p2 }
  0x62   :  { %p3297_p5 = pnand %p3296_p4, %p3290_p1 }
  0x64   :  { %3300 = shalt.err (!%p3297_p5)
}
  0x65   :  { %80 = dma.hbm_to_vmem [thread:$0]  %s4067_s4, 2048, %s3522_s20, [#allocation9], %s3381_s21, %s3381_s21, %s3382_s22  }
  0x66   :  { %s3387_s16 = smov [#allocation13]   ;;  %s3301_s24 = scalar_lea.hbm %s4069_s6, 1024 }
  0x67   :  { %s98_s18 = sshll.u32 %s3387_s16, 4  ;;  %p3302_p6 = scmp.ne.s32.totalorder %s4069_s6, %s3301_s24  ;;  %s99_s18 = int_to_ptr.vmem [resolvable:$true] %s98_s18 }
  0x68   :  { %p3305_p7 = scmp.lt.u32.totalorder %s3301_s24, %s4069_s6 }
  0x6a   :  { %p3307_p8 = pnand %p3305_p7, %p3302_p6 }
  0x6c   :  { %3310 = shalt.err (!%p3307_p8)
}
  0x6d   :  { %s3311_s27 = scalar_lea.vmem %s99_s18, 1024  ;;  %p3316_p10 = scmp.lt.s32.totalorder %s99_s18, %s99_s18 }
  0x6e   :  { %p3312_p9 = scmp.ne.s32.totalorder %s99_s18, %s3311_s27  ;;  %p3317_p11 = scmp.lt.s32.totalorder %s3311_s27, %s3311_s27 }
  0x70   :  { %p3318_p12 = por %p3317_p11, %p3316_p10 }
  0x72   :  { %p3319_p13 = pnand %p3318_p12, %p3312_p9 }
  0x74   :  { %3322 = shalt.err (!%p3319_p13)
}
  0x75   :  { %104 = dma.hbm_to_vmem [thread:$0]  %s4069_s6, 1024, %s99_s18, [#allocation12], %s3381_s21, %s3381_s21, %s3382_s22  }
  0x76   :  { %3367 = dma.done.wait [#allocation3], 512  }
  0x77   :  { %3368 = vsyncadd [#allocation3], 4294966784 }
  0x78   :  { %3369 = dma.done.wait [#allocation6], 1024  }
  0x79   :  { %3370 = vsyncadd [#allocation6], 4294966272 }
  0x7a   :  { %3371 = dma.done.wait [#allocation9], 4096  }
  0x7b   :  { %3372 = vsyncadd [#allocation9], 4294963200 }
  0x7c   :  { %3373 = dma.done.wait [#allocation12], 1536  }
  0x7d   :  { %3374 = vsyncadd [#allocation12], 4294965760  ;;  %vm145_vm0 = vcmask 261120   ;;  %v3574_v0 = vld [vmem:[#allocation11] sm:$0xff]  ;;  %v3576_v1 = vld [vmem:[#allocation11 + $0x8] sm:$0xff]  ;;  %v141_v11 = vlaneseq  ;;  %vm275_vm1 = vcmask 64512  }
  0x7e   :  { %v135_v2 = vld [vmem:[#allocation11 + $0x10] sm:$0xff]  ;;  %v3068_v3 = vpack.i.bf16 %v3576_v1, %v3574_v0  ;;  %v2857_v4 = vpack.c.bf16 %v3576_v1, %v3574_v0  ;;  %v136_v5 = vld [vmem:[#allocation11 + $0x18] sm:$0xff]  ;;  %v137_v6 = vld [vmem:[#allocation2] sm:$0xff]  ;;  %s3388_s17 = smov 120   ;;  %s3389_s28 = smov 112   ;;  %vm1064_vm4 = vcmask 130048  }
  0x7f   :  { %v2861_v7 = vpack.c.bf16 %v136_v5, %v135_v2  ;;  %2697 = vmatprep.mubr.msk.f32.mxu1 %vm145_vm0, %v137_v6  ;;  %v138_v8 = vld [vmem:[#allocation2 + $0x8] sm:$0xff]  ;;  %v139_v9 = vld [vmem:[#allocation2 + $0x10] sm:$0xff]  ;;  %v140_v10 = vld [vmem:[#allocation2 + $0x18] sm:$0xff]  ;;  %v3586_v12 = vshrl.u32 %v141_v11, 7  ;;  %s3390_s29 = smov 104   ;;  %s3391_s30 = smov 96  }
  0x80   :  { %2858 = vmatprep.subr.bf16.mxu1 %v2857_v4  ;;  %v128_v14 = vld [vmem:[%s4070_s7] sm:$0xff]  ;;  %s3392_s11 = smov 64   ;;  %vm3656_vm2 = vmpackc.low %vm275_vm1, %vm275_vm1  ;;  %v1018_v47 = vld [vmem:[#allocation10 + $0x10] sm:$0xff]  ;;  %s3393_s13 = smov 32  }
  0x81   :  { %2860 = vmatpush3.bf16.msra.mxu1 %v2857_v4  ;;  %v143_v13 = vsub.s32 0, %v3586_v12  ;;  %vm1034_vm7 = vcmp.eq.f32.partialorder %v1018_v47, 0.0  ;;  %v995_v47 = vld [vmem:[#allocation8 + $0x58] sm:$0xff]  ;;  %s3394_s1 = smov 16   ;;  %s3395_s10 = smov 24  }
  0x82   :  { %2862 = vmatprep.subr.bf16.mxu1 %v2861_v7 }
  0x83   :  { %v3592_v15 = vrot.slane %v128_v14, %v143_v13 }
  0x85   :  { %2864 = vmatpush3.bf16.msra.mxu1 %v2861_v7 }
  0x88   :  { %2698 = vmatmul.mubr.msk.f32.vlgmr.msra.gmra.mrb[0].mxu1 %vm145_vm0, %v138_v8 }
  0x89   :  { %2700 = vmatprep.mubr.msk.f32.mxu1 %vm145_vm0, %v139_v9 }
  0x8c   :  { %2701 = vmatmul.mubr.msk.f32.gmra.mrb[2].mxu1 %vm145_vm0, %v140_v10 }
 0x15b   :  { %v2699_v16 = vpop.f32.mrb[0].mxu1 }
 0x15c   :  { %v224_v17 = vpop.f32.mrb[1].mxu1  ;;  %v230_v22 = vadd.f32 %v2699_v16, %v3592_v15 }
 0x15d   :  { %v225_v18 = vadd.f32 %v224_v17, %v3592_v15 }
 0x15f   :  { %v2702_v19 = vpop.f32.mrb[2].mxu1  ;;  %247 = vrot.lane.b32.xlu0 %v225_v18, %s3388_s17  ;;  %2707 = vmatprep.mubr.msk.f32.mxu1 %vm275_vm1, %v225_v18  ;;  %v2988_v24 = vpack.i.bf16 %v230_v22, %v225_v18 }
 0x160   :  { %v3597_v20 = vadd.f32 %v2702_v19, %v3592_v15  ;;  %v234_v21 = vpop.f32.mrb[3].mxu1 }
 0x161   :  { %v235_v23 = vadd.f32 %v234_v21, %v3592_v15 }
 0x162   :  { %253 = vrot.lane.b32.xlu1 %v3597_v20, %s3388_s17 }
 0x163   :  { %2714 = vmatprep.mubr.msk.f32.mxu0 %vm275_vm1, %v235_v23  ;;  %249 = vrot.lane.b32.xlu0 %v230_v22, %s3388_s17  ;;  %v2993_v25 = vpack.i.bf16 %v3597_v20, %v235_v23 }
 0x166   :  { %251 = vrot.lane.b32.xlu1 %v235_v23, %s3388_s17 }
 0x167   :  { %255 = vrot.lane.b32.xlu0 %v225_v18, %s3389_s28 }
 0x16a   :  { %257 = vrot.lane.b32.xlu1 %v230_v22, %s3389_s28 }
 0x16b   :  { %259 = vrot.lane.b32.xlu0 %v235_v23, %s3389_s28 }
 0x16e   :  { %261 = vrot.lane.b32.xlu1 %v3597_v20, %s3389_s28 }
 0x16f   :  { %263 = vrot.lane.b32.xlu0 %v225_v18, %s3390_s29 }
 0x172   :  { %265 = vrot.lane.b32.xlu1 %v230_v22, %s3390_s29 }
 0x173   :  { %267 = vrot.lane.b32.xlu0 %v235_v23, %s3390_s29 }
 0x176   :  { %269 = vrot.lane.b32.xlu1 %v3597_v20, %s3390_s29 }
 0x177   :  { %2989 = vrot.lane.b32.xlu0 %v2988_v24, %s3391_s30 }
 0x17a   :  { %2994 = vrot.lane.b32.xlu1 %v2993_v25, %s3391_s30 }
 0x1d1   :  { %v248_v26 = vpop.permute.xlu0 %247 }
 0x1d4   :  { %v3608_v27 = vpop.permute.xlu1 %253 }
 0x1d5   :  { %v3610_v28 = vpop.permute.xlu0 %249 }
 0x1d6   :  { %v2998_v29 = vpack.i.bf16 %v3610_v28, %v248_v26 }
 0x1d8   :  { %v252_v30 = vpop.permute.xlu1 %251  ;;  %2999 = vrot.lane.b32.xlu0 %v2998_v29, %s3391_s30 }
 0x1d9   :  { %v3003_v31 = vpack.i.bf16 %v3608_v27, %v252_v30  ;;  %v256_v32 = vpop.permute.xlu0 %255 }
 0x1db   :  { %3004 = vrot.lane.b32.xlu1 %v3003_v31, %s3391_s30 }
 0x1dc   :  { %v3616_v33 = vpop.permute.xlu1 %257 }
 0x1dd   :  { %v3619_v34 = vpack.i.bf16 %v3616_v33, %v256_v32  ;;  %v3621_v35 = vpop.permute.xlu0 %259 }
 0x1df   :  { %3009 = vrot.lane.b32.xlu0 %v3619_v34, %s3391_s30 }
 0x1e0   :  { %v3625_v36 = vpop.permute.xlu1 %261 }
 0x1e1   :  { %v3629_v37 = vpack.i.bf16 %v3625_v36, %v3621_v35  ;;  %v3631_v38 = vpop.permute.xlu0 %263 }
 0x1e3   :  { %3014 = vrot.lane.b32.xlu1 %v3629_v37, %s3391_s30 }
 0x1e4   :  { %v3635_v39 = vpop.permute.xlu1 %265 }
 0x1e5   :  { %v3639_v40 = vpack.i.bf16 %v3635_v39, %v3631_v38  ;;  %v3641_v41 = vpop.permute.xlu0 %267 }
 0x1e7   :  { %3019 = vrot.lane.b32.xlu0 %v3639_v40, %s3391_s30 }
 0x1e8   :  { %v3645_v42 = vpop.permute.xlu1 %269 }
 0x1e9   :  { %v3649_v43 = vpack.i.bf16 %v3645_v42, %v3641_v41  ;;  %v2990_v44 = vpop.permute.xlu0 %2989 }
 0x1ea   :  { %v2992_v45 = vunpack.i.h.bf16 %v2990_v44  ;;  %v2991_v46 = vunpack.i.l.bf16 %v2990_v44  ;;  %v1019_v44 = vld [vmem:[#allocation10 + $0x18] sm:$0xff] }
 0x1eb   :  { %3034 = vrot.lane.b32.xlu0 %v2993_v25, %s3392_s11  ;;  %3024 = vrot.lane.b32.xlu1 %v3649_v43, %s3391_s30  ;;  %vm1035_vm6 = vcmp.eq.f32.partialorder %v1019_v44, 0.0 }
 0x1ec   :  { %v2865_v48 = vpack.c.bf16 %v2992_v45, %v2991_v46  ;;  %v2995_v49 = vpop.permute.xlu1 %2994  ;;  %v987_v46 = vld [vmem:[#allocation8 + $0x18] sm:$0xff] }
 0x1ed   :  { %v2997_v50 = vunpack.i.h.bf16 %v2995_v49  ;;  %v2996_v51 = vunpack.i.l.bf16 %v2995_v49 }
 0x1ee   :  { %2867 = vmatprep.subr.msk.bf16.mxu1 %vm3656_vm2, %v2865_v48 }
 0x1ef   :  { %3029 = vrot.lane.b32.xlu1 %v2988_v24, %s3392_s11  ;;  %2870 = vmatpush3.bf16.xpose.msk.msra.mxu1 %vm3656_vm2, %v2865_v48  ;;  %v2871_v52 = vpack.c.bf16 %v2997_v50, %v2996_v51  ;;  %v986_v50 = vld [vmem:[#allocation8 + $0x10] sm:$0xff] }
 0x1f1   :  { %2873 = vmatprep.subr.msk.bf16.mxu0 %vm3656_vm2, %v2871_v52 }
 0x1f2   :  { %2876 = vmatpush3.bf16.xpose.msk.msra.mxu0 %vm3656_vm2, %v2871_v52 }
 0x1f3   :  { %3039 = vrot.lane.b32.xlu1 %v2998_v29, %s3392_s11 }
 0x1f6   :  { %2708 = vmatmul.mubr.msk.f32.vlgmr.msra.gmra.mrb[4].mxu1 %vm275_vm1, %v230_v22 }
 0x1f7   :  { %3044 = vrot.lane.b32.xlu1 %v3003_v31, %s3392_s11  ;;  %2721 = vmatprep.mubr.msk.f32.mxu1 %vm275_vm1, %v248_v26 }
 0x1f9   :  { %2715 = vmatmul.mubr.msk.f32.vlgmr.msra.gmra.mrb[0].mxu0 %vm275_vm1, %v3597_v20 }
 0x1fa   :  { %2728 = vmatprep.mubr.msk.f32.mxu0 %vm275_vm1, %v252_v30  ;;  %v1017_v30 = vld [vmem:[#allocation10 + $0x8] sm:$0xff] }
 0x1fb   :  { %vm1033_vm3 = vcmp.eq.f32.partialorder %v1017_v30, 0.0  ;;  %v992_v30 = vld [vmem:[#allocation8 + $0x40] sm:$0xff] }
 0x24a   :  { %v3000_v53 = vpop.permute.xlu0 %2999 }
 0x24b   :  { %v3002_v54 = vunpack.i.h.bf16 %v3000_v53  ;;  %v3001_v55 = vunpack.i.l.bf16 %v3000_v53 }
 0x24d   :  { %v2877_v56 = vpack.c.bf16 %v3002_v54, %v3001_v55  ;;  %v3005_v57 = vpop.permute.xlu1 %3004 }
 0x24e   :  { %v3007_v58 = vunpack.i.h.bf16 %v3005_v57  ;;  %v3006_v59 = vunpack.i.l.bf16 %v3005_v57 }
 0x24f   :  { %2879 = vmatprep.subr.msk.bf16.mxu1 %vm3656_vm2, %v2877_v56 }
 0x250   :  { %v2883_v60 = vpack.c.bf16 %v3007_v58, %v3006_v59  ;;  %2882 = vmatpush3.bf16.xpose.msk.msra.mxu1 %vm3656_vm2, %v2877_v56 }
 0x251   :  { %v3010_v61 = vpop.permute.xlu0 %3009 }
 0x252   :  { %v3012_v62 = vunpack.i.h.bf16 %v3010_v61  ;;  %v3011_v63 = vunpack.i.l.bf16 %v3010_v61  ;;  %2885 = vmatprep.subr.msk.bf16.mxu0 %vm3656_vm2, %v2883_v60 }
 0x253   :  { %2888 = vmatpush3.bf16.xpose.msk.msra.mxu0 %vm3656_vm2, %v2883_v60 }
 0x254   :  { %v2889_v2 = vpack.c.bf16 %v3012_v62, %v3011_v63  ;;  %v1021_v62 = vld [vmem:[#allocation10 + $0x28] sm:$0xff] }
 0x255   :  { %v3015_v4 = vpop.permute.xlu1 %3014  ;;  %vm1037_vm8 = vcmp.eq.f32.partialorder %v1021_v62, 0.0 }
 0x256   :  { %v3017_v5 = vunpack.i.h.bf16 %v3015_v4  ;;  %v3016_v6 = vunpack.i.l.bf16 %v3015_v4  ;;  %2891 = vmatprep.subr.msk.bf16.mxu1 %vm3656_vm2, %v2889_v2  ;;  %v1020_v4 = vld [vmem:[#allocation10 + $0x20] sm:$0xff] }
 0x257   :  { %2722 = vmatmul.mubr.msk.f32.vlgmr.msra.gmra.mrb[6].mxu1 %vm275_vm1, %v3610_v28  ;;  %vm1036_vm9 = vcmp.eq.f32.partialorder %v1020_v4, 0.0  ;;  %v997_v4 = vld [vmem:[#allocation8 + $0x68] sm:$0xff] }
 0x258   :  { %v2895_v7 = vpack.c.bf16 %v3017_v5, %v3016_v6  ;;  %2894 = vmatpush3.bf16.xpose.msk.msra.mxu1 %vm3656_vm2, %v2889_v2  ;;  %2735 = vmatprep.mubr.msk.f32.mxu1 %vm275_vm1, %v256_v32  ;;  %v985_v32 = vld [vmem:[#allocation8 + $0x8] sm:$0xff] }
 0x259   :  { %v3020_v8 = vpop.permute.xlu0 %3019  ;;  %v989_v2 = vld [vmem:[#allocation8 + $0x28] sm:$0xff] }
 0x25a   :  { %v3022_v9 = vunpack.i.h.bf16 %v3020_v8  ;;  %v3021_v10 = vunpack.i.l.bf16 %v3020_v8  ;;  %2729 = vmatmul.mubr.msk.f32.vlgmr.msra.gmra.mrb[2].mxu0 %vm275_vm1, %v3608_v27  ;;  %2897 = vmatprep.subr.msk.bf16.mxu0 %vm3656_vm2, %v2895_v7 }
 0x25b   :  { %2900 = vmatpush3.bf16.xpose.msk.msra.mxu0 %vm3656_vm2, %v2895_v7  ;;  %2742 = vmatprep.mubr.msk.f32.mxu0 %vm275_vm1, %v3621_v35  ;;  %v988_v7 = vld [vmem:[#allocation8 + $0x20] sm:$0xff] }
 0x25c   :  { %v2901_v11 = vpack.c.bf16 %v3022_v9, %v3021_v10  ;;  %v1023_v9 = vld [vmem:[#allocation10 + $0x38] sm:$0xff] }
 0x25d   :  { %v3025_v13 = vpop.permute.xlu1 %3024  ;;  %v3035_v18 = vpop.permute.xlu0 %3034  ;;  %vm1039_vm10 = vcmp.eq.f32.partialorder %v1023_v9, 0.0 }
 0x25e   :  { %v3027_v14 = vunpack.i.h.bf16 %v3025_v13  ;;  %v3026_v16 = vunpack.i.l.bf16 %v3025_v13  ;;  %2903 = vmatprep.subr.msk.bf16.mxu1 %vm3656_vm2, %v2901_v11  ;;  %v3037_v22 = vunpack.i.h.bf16 %v3035_v18  ;;  %v3036_v23 = vunpack.i.l.bf16 %v3035_v18  ;;  %v991_v13 = vld [vmem:[#allocation8 + $0x38] sm:$0xff] }
 0x25f   :  { %2736 = vmatmul.mubr.msk.f32.vlgmr.msra.gmra.mrb[8].mxu1 %vm275_vm1, %v3616_v33  ;;  %v1016_v33 = vld [vmem:[#allocation10] sm:$0xff] }
 0x260   :  { %v2907_v17 = vpack.c.bf16 %v3027_v14, %v3026_v16  ;;  %2906 = vmatpush3.bf16.xpose.msk.msra.mxu1 %vm3656_vm2, %v2901_v11  ;;  %2749 = vmatprep.mubr.msk.f32.mxu1 %vm275_vm1, %v3631_v38  ;;  %v3715_v28 = vpack.c.bf16 %v3037_v22, %v3036_v23  ;;  %v984_v38 = vld [vmem:[#allocation8] sm:$0xff]  ;;  %vm1032_vm5 = vcmp.eq.f32.partialorder %v1016_v33, 0.0  ;;  %v1022_v14 = vld [vmem:[#allocation10 + $0x30] sm:$0xff] }
 0x261   :  { %v3030_v19 = vpop.permute.xlu1 %3029  ;;  %vm1038_vm11 = vcmp.eq.f32.partialorder %v1022_v14, 0.0 }
 0x262   :  { %v3032_v20 = vunpack.i.h.bf16 %v3030_v19  ;;  %v3031_v21 = vunpack.i.l.bf16 %v3030_v19  ;;  %2743 = vmatmul.mubr.msk.f32.vlgmr.msra.gmra.mrb[4].mxu0 %vm275_vm1, %v3625_v36  ;;  %2909 = vmatprep.subr.msk.bf16.mxu0 %vm3656_vm2, %v2907_v17  ;;  %v990_v19 = vld [vmem:[#allocation8 + $0x30] sm:$0xff] }
 0x263   :  { %2912 = vmatpush3.bf16.xpose.msk.msra.mxu0 %vm3656_vm2, %v2907_v17  ;;  %2756 = vmatprep.mubr.msk.f32.mxu0 %vm275_vm1, %v3641_v41 }
 0x264   :  { %v2913_v24 = vpack.c.bf16 %v3032_v20, %v3031_v21 }
 0x265   :  { %v3040_v25 = vpop.permute.xlu1 %3039 }
 0x266   :  { %v3042_v26 = vunpack.i.h.bf16 %v3040_v25  ;;  %v3041_v27 = vunpack.i.l.bf16 %v3040_v25  ;;  %2914 = vmatprep.subr.bf16.mxu1 %v2913_v24 }
 0x267   :  { %2750 = vmatmul.mubr.msk.f32.vlgmr.msra.gmra.mrb[10].mxu1 %vm275_vm1, %v3635_v39 }
 0x268   :  { %v2921_v29 = vpack.c.bf16 %v3042_v26, %v3041_v27  ;;  %2916 = vmatpush3.bf16.msra.mxu1 %v2913_v24  ;;  %v1025_v26 = vld [vmem:[#allocation10 + $0x48] sm:$0xff] }
 0x269   :  { %2918 = vmatprep.subr.bf16.mxu1 %v3715_v28  ;;  %vm1041_vm12 = vcmp.eq.f32.partialorder %v1025_v26, 0.0  ;;  %v998_v26 = vld [vmem:[#allocation8 + $0x70] sm:$0xff] }
 0x26a   :  { %2757 = vmatmul.mubr.msk.f32.vlgmr.msra.gmra.mrb[6].mxu0 %vm275_vm1, %v3645_v42  ;;  %2922 = vmatprep.subr.bf16.mxu0 %v2921_v29 }
 0x26b   :  { %2924 = vmatpush3.bf16.msra.mxu0 %v2921_v29  ;;  %v993_v29 = vld [vmem:[#allocation8 + $0x48] sm:$0xff] }
 0x2c9   :  { %v2709_v31 = vpop.f32.mrb[4].mxu1 }
 0x2ca   :  { %v969_v35 = vmul.f32 0.35355338, %v2709_v31  ;;  %v350_v36 = vpop.f32.mrb[5].mxu1 }
 0x2cb   :  { %v968_v41 = vmul.f32 0.35355338, %v350_v36 }
 0x2cc   :  { %v1001_v39 = vadd.f32 %v985_v32, %v969_v35  ;;  %v2716_v45 = vpop.f32.mrb[0].mxu0  ;;  %v1024_v32 = vld [vmem:[#allocation10 + $0x40] sm:$0xff] }
 0x2cd   :  { %v1000_v48 = vadd.f32 %v984_v38, %v968_v41  ;;  %v971_v42 = vmul.f32 0.35355338, %v2716_v45  ;;  %v437_v49 = vpop.f32.mrb[1].mxu0  ;;  %vm1040_vm13 = vcmp.eq.f32.partialorder %v1024_v32, 0.0 }
 0x2ce   :  { %v970_v51 = vmul.f32 0.35355338, %v437_v49  ;;  %v3722_v52 = vsel %vm1033_vm3, -32767.0, %v1001_v39  ;;  %v1027_v39 = vld [vmem:[#allocation10 + $0x58] sm:$0xff] }
 0x2cf   :  { %v1003_v53 = vadd.f32 %v987_v46, %v971_v42  ;;  %v1084_v54 = vsel %vm1064_vm4, %v3722_v52, -inf  ;;  %1066 = vst.msk [vmem:[#allocation15 + $0x8] sm:$0xff] %vm1064_vm4, %v3722_v52  ;;  %v3728_v55 = vsel %vm1032_vm5, -32767.0, %v1000_v48  ;;  %v1026_v48 = vld [vmem:[#allocation10 + $0x50] sm:$0xff]  ;;  %vm1043_vm14 = vcmp.eq.f32.partialorder %v1027_v39, 0.0 }
 0x2d0   :  { %v1002_v56 = vadd.f32 %v986_v50, %v970_v51  ;;  %1085 = vmax.xlane.f32.xlu1 %v1084_v54  ;;  %v1081_v57 = vsel %vm1064_vm4, %v3728_v55, -inf  ;;  %1065 = vst.msk [vmem:[#allocation15] sm:$0xff] %vm1064_vm4, %v3728_v55  ;;  %v994_v51 = vld [vmem:[#allocation8 + $0x50] sm:$0xff]  ;;  %vm1042_vm15 = vcmp.eq.f32.partialorder %v1026_v48, 0.0 }
 0x2d1   :  { %1082 = vmax.xlane.f32.xlu0 %v1081_v57  ;;  %v3734_v58 = vsel %vm1035_vm6, -32767.0, %v1003_v53 }
 0x2d2   :  { %1068 = vst.msk [vmem:[#allocation15 + $0x18] sm:$0xff] %vm1064_vm4, %v3734_v58  ;;  %v1090_v59 = vsel %vm1064_vm4, %v3734_v58, -inf  ;;  %v3740_v60 = vsel %vm1034_vm7, -32767.0, %v1002_v56  ;;  %vm2009_vm7 = vcmask 195584  }
 0x2d3   :  { %1067 = vst.msk [vmem:[#allocation15 + $0x10] sm:$0xff] %vm1064_vm4, %v3740_v60  ;;  %v1087_v61 = vsel %vm1064_vm4, %v3740_v60, -inf }
 0x2d4   :  { %1091 = vmax.xlane.f32.xlu1 %v1090_v59 }
 0x2d5   :  { %1088 = vmax.xlane.f32.xlu0 %v1087_v61 }
 0x32a   :  { %v2723_v63 = vpop.f32.mrb[6].mxu1 }
 0x32b   :  { %v973_v5 = vmul.f32 0.35355338, %v2723_v63  ;;  %v524_v6 = vpop.f32.mrb[7].mxu1  ;;  %v1029_v63 = vld [vmem:[#allocation10 + $0x68] sm:$0xff] }
 0x32c   :  { %v972_v8 = vmul.f32 0.35355338, %v524_v6  ;;  %vm1045_vm2 = vcmp.eq.f32.partialorder %v1029_v63, 0.0 }
 0x32d   :  { %v1005_v10 = vadd.f32 %v989_v2, %v973_v5  ;;  %v2730_v11 = vpop.f32.mrb[2].mxu0  ;;  %v996_v5 = vld [vmem:[#allocation8 + $0x60] sm:$0xff] }
 0x32e   :  { %v1004_v16 = vadd.f32 %v988_v7, %v972_v8  ;;  %v975_v17 = vmul.f32 0.35355338, %v2730_v11  ;;  %v611_v18 = vpop.f32.mrb[3].mxu0  ;;  %v1028_v7 = vld [vmem:[#allocation10 + $0x60] sm:$0xff] }
 0x32f   :  { %v974_v20 = vmul.f32 0.35355338, %v611_v18  ;;  %v3746_v21 = vsel %vm1037_vm8, -32767.0, %v1005_v10  ;;  %vm1044_vm3 = vcmp.eq.f32.partialorder %v1028_v7, 0.0 }
 0x330   :  { %v1007_v22 = vadd.f32 %v991_v13, %v975_v17  ;;  %v1096_v23 = vsel %vm1064_vm4, %v3746_v21, -inf  ;;  %1070 = vst.msk [vmem:[#allocation15 + $0x28] sm:$0xff] %vm1064_vm4, %v3746_v21  ;;  %v3752_v24 = vsel %vm1036_vm9, -32767.0, %v1004_v16  ;;  %v1031_v16 = vld [vmem:[#allocation10 + $0x78] sm:$0xff] }
 0x331   :  { %v1006_v25 = vadd.f32 %v990_v19, %v974_v20  ;;  %1097 = vmax.xlane.f32.xlu0 %v1096_v23  ;;  %1069 = vst.msk [vmem:[#allocation15 + $0x20] sm:$0xff] %vm1064_vm4, %v3752_v24  ;;  %v1093_v44 = vsel %vm1064_vm4, %v3752_v24, -inf  ;;  %v999_v19 = vld [vmem:[#allocation8 + $0x78] sm:$0xff]  ;;  %v1030_v20 = vld [vmem:[#allocation10 + $0x70] sm:$0xff]  ;;  %vm1047_vm5 = vcmp.eq.f32.partialorder %v1031_v16, 0.0 }
 0x332   :  { %v2737_v27 = vpop.f32.mrb[8].mxu1  ;;  %v3756_v31 = vsel %vm1039_vm10, -32767.0, %v1007_v22  ;;  %vm1046_vm6 = vcmp.eq.f32.partialorder %v1030_v20, 0.0 }
 0x333   :  { %v977_v33 = vmul.f32 0.35355338, %v2737_v27  ;;  %v698_v35 = vpop.f32.mrb[9].mxu1  ;;  %1072 = vst.msk [vmem:[#allocation15 + $0x38] sm:$0xff] %vm1064_vm4, %v3756_v31  ;;  %v1102_v36 = vsel %vm1064_vm4, %v3756_v31, -inf }
 0x334   :  { %v3762_v38 = vsel %vm1038_vm11, -32767.0, %v1006_v25  ;;  %v976_v41 = vmul.f32 0.35355338, %v698_v35  ;;  %1103 = vmax.xlane.f32.xlu1 %v1102_v36 }
 0x335   :  { %1071 = vst.msk [vmem:[#allocation15 + $0x30] sm:$0xff] %vm1064_vm4, %v3762_v38  ;;  %v1009_v45 = vadd.f32 %v993_v29, %v977_v33  ;;  %v2744_v46 = vpop.f32.mrb[4].mxu0  ;;  %1094 = vmax.xlane.f32.xlu0 %v1093_v44  ;;  %v1099_v54 = vsel %vm1064_vm4, %v3762_v38, -inf }
 0x336   :  { %v1008_v42 = vadd.f32 %v992_v30, %v976_v41  ;;  %v979_v49 = vmul.f32 0.35355338, %v2744_v46  ;;  %v785_v50 = vpop.f32.mrb[5].mxu0 }
 0x337   :  { %v978_v53 = vmul.f32 0.35355338, %v785_v50  ;;  %v3770_v56 = vsel %vm1041_vm12, -32767.0, %v1009_v45 }
 0x338   :  { %v1011_v57 = vadd.f32 %v995_v47, %v979_v49  ;;  %1100 = vmax.xlane.f32.xlu1 %v1099_v54  ;;  %v1108_v59 = vsel %vm1064_vm4, %v3770_v56, -inf  ;;  %1074 = vst.msk [vmem:[#allocation15 + $0x48] sm:$0xff] %vm1064_vm4, %v3770_v56  ;;  %v3776_v61 = vsel %vm1040_vm13, -32767.0, %v1008_v42  ;;  %v3820_v47 = vpop.permute.xlu1 %3044 }
 0x339   :  { %v1010_v62 = vadd.f32 %v994_v51, %v978_v53  ;;  %1109 = vmax.xlane.f32.xlu0 %v1108_v59  ;;  %1073 = vst.msk [vmem:[#allocation15 + $0x40] sm:$0xff] %vm1064_vm4, %v3776_v61  ;;  %v1105_v14 = vsel %vm1064_vm4, %v3776_v61, -inf }
 0x33a   :  { %v2751_v2 = vpop.f32.mrb[10].mxu1  ;;  %v3780_v6 = vsel %vm1043_vm14, -32767.0, %v1011_v57 }
 0x33b   :  { %v981_v8 = vmul.f32 0.35355338, %v2751_v2  ;;  %v872_v9 = vpop.f32.mrb[11].mxu1  ;;  %1076 = vst.msk [vmem:[#allocation15 + $0x58] sm:$0xff] %vm1064_vm4, %v3780_v6  ;;  %v1114_v10 = vsel %vm1064_vm4, %v3780_v6, -inf }
 0x33c   :  { %v3786_v11 = vsel %vm1042_vm15, -32767.0, %v1010_v62  ;;  %v980_v13 = vmul.f32 0.35355338, %v872_v9  ;;  %1115 = vmax.xlane.f32.xlu1 %v1114_v10 }
 0x33d   :  { %1075 = vst.msk [vmem:[#allocation15 + $0x50] sm:$0xff] %vm1064_vm4, %v3786_v11  ;;  %v1013_v17 = vadd.f32 %v997_v4, %v981_v8  ;;  %v2758_v18 = vpop.f32.mrb[6].mxu0  ;;  %1106 = vmax.xlane.f32.xlu0 %v1105_v14  ;;  %v1111_v29 = vsel %vm1064_vm4, %v3786_v11, -inf }
 0x33e   :  { %v1012_v22 = vadd.f32 %v996_v5, %v980_v13  ;;  %v983_v23 = vmul.f32 0.35355338, %v2758_v18  ;;  %v959_v25 = vpop.f32.mrb[7].mxu0 }
 0x33f   :  { %v982_v27 = vmul.f32 0.35355338, %v959_v25  ;;  %v3794_v30 = vsel %vm1045_vm2, -32767.0, %v1013_v17 }
 0x340   :  { %v1015_v32 = vadd.f32 %v999_v19, %v983_v23  ;;  %1112 = vmax.xlane.f32.xlu1 %v1111_v29  ;;  %v1120_v33 = vsel %vm1064_vm4, %v3794_v30, -inf  ;;  %1078 = vst.msk [vmem:[#allocation15 + $0x68] sm:$0xff] %vm1064_vm4, %v3794_v30  ;;  %v3800_v35 = vsel %vm1044_vm3, -32767.0, %v1012_v22 }
 0x341   :  { %v1014_v36 = vadd.f32 %v998_v26, %v982_v27  ;;  %1121 = vmax.xlane.f32.xlu0 %v1120_v33  ;;  %1077 = vst.msk [vmem:[#allocation15 + $0x60] sm:$0xff] %vm1064_vm4, %v3800_v35  ;;  %v1117_v45 = vsel %vm1064_vm4, %v3800_v35, -inf }
 0x342   :  { %v3804_v41 = vsel %vm1047_vm5, -32767.0, %v1015_v32 }
 0x343   :  { %v3806_v44 = vsel %vm1046_vm6, -32767.0, %v1014_v36  ;;  %1080 = vst.msk [vmem:[#allocation15 + $0x78] sm:$0xff] %vm1064_vm4, %v3804_v41  ;;  %v1126_v46 = vsel %vm1064_vm4, %v3804_v41, -inf }
 0x344   :  { %1079 = vst.msk [vmem:[#allocation15 + $0x70] sm:$0xff] %vm1064_vm4, %v3806_v44  ;;  %v1123_v39 = vsel %vm1064_vm4, %v3806_v44, -inf }
 0x345   :  { %1124 = vmax.xlane.f32.xlu1 %v1123_v39  ;;  %1118 = vmax.xlane.f32.xlu0 %v1117_v45 }
 0x349   :  { %1127 = vmax.xlane.f32.xlu0 %v1126_v46 }
 0x356   :  { %3054 = vrot.lane.b32.xlu1 %v3629_v37, %s3392_s11 }
 0x35d   :  { %v1086_v48 = vpop.xlane.xlu1 %1085 }
 0x35e   :  { %v1083_v42 = vpop.xlane.xlu0 %1082  ;;  %v1130_v51 = vsub.f32 %v3722_v52, %v1086_v48 }
 0x35f   :  { %3049 = vrot.lane.b32.xlu0 %v3619_v34, %s3392_s11  ;;  %v1129_v49 = vsub.f32 %v3728_v55, %v1083_v42 }
 0x360   :  { %v1147_v59 = vmul.f32 1.442695, %v1130_v51 }
 0x361   :  { %v1092_v50 = vpop.xlane.xlu1 %1091  ;;  %v1145_v53 = vmul.f32 1.442695, %v1129_v49 }
 0x362   :  { %v1132_v54 = vsub.f32 %v3734_v58, %v1092_v50  ;;  %v1089_v57 = vpop.xlane.xlu0 %1088 }
 0x363   :  { %3078 = vpow2.f32 %v1145_v53  ;;  %v1131_v37 = vsub.f32 %v3740_v60, %v1089_v57 }
 0x364   :  { %v1151_v62 = vmul.f32 1.442695, %v1132_v54  ;;  %3080 = vpow2.f32 %v1147_v59 }
 0x365   :  { %v1149_v63 = vmul.f32 1.442695, %v1131_v37 }
 0x366   :  { %3082 = vpow2.f32 %v1151_v62 }
 0x367   :  { %3084 = vpow2.f32 %v1149_v63 }
 0x36d   :  { %v3828_v34 = vpop.eup %3078 }
 0x36e   :  { %v3830_v2 = vpop.eup %3080  ;;  %v1177_v52 = vsel %vm1064_vm4, %v3828_v34, 0.0 }
 0x36f   :  { %v1180_v60 = vsel %vm1064_vm4, %v3830_v2, 0.0 }
 0x370   :  { %v3834_v55 = vpop.eup %3082 }
 0x371   :  { %v1186_v58 = vsel %vm1064_vm4, %v3834_v55, 0.0  ;;  %v3840_v4 = vpop.eup %3084 }
 0x372   :  { %v1183_v5 = vsel %vm1064_vm4, %v3840_v4, 0.0 }
 0x37a   :  { %1178 = vadd.xlane.f32.xlu1 %v1177_v52 }
 0x37e   :  { %1187 = vadd.xlane.f32.xlu1 %v1186_v58  ;;  %1181 = vadd.xlane.f32.xlu0 %v1180_v60 }
 0x382   :  { %1184 = vadd.xlane.f32.xlu1 %v1183_v5 }
 0x3be   :  { %v1098_v7 = vpop.xlane.xlu0 %1097 }
 0x3bf   :  { %v1134_v8 = vsub.f32 %v3746_v21, %v1098_v7 }
 0x3c1   :  { %v1155_v9 = vmul.f32 1.442695, %v1134_v8  ;;  %v1104_v10 = vpop.xlane.xlu1 %1103 }
 0x3c2   :  { %v1136_v13 = vsub.f32 %v3756_v31, %v1104_v10  ;;  %v1095_v14 = vpop.xlane.xlu0 %1094 }
 0x3c3   :  { %3086 = vpow2.f32 %v1155_v9  ;;  %v1133_v16 = vsub.f32 %v3752_v24, %v1095_v14 }
 0x3c4   :  { %v1159_v17 = vmul.f32 1.442695, %v1136_v13 }
 0x3c5   :  { %v1153_v18 = vmul.f32 1.442695, %v1133_v16  ;;  %v1101_v19 = vpop.xlane.xlu1 %1100 }
 0x3c6   :  { %3088 = vpow2.f32 %v1159_v17  ;;  %v1135_v20 = vsub.f32 %v3762_v38, %v1101_v19  ;;  %v1110_v22 = vpop.xlane.xlu0 %1109 }
 0x3c7   :  { %3090 = vpow2.f32 %v1153_v18  ;;  %v1138_v23 = vsub.f32 %v3770_v56, %v1110_v22 }
 0x3c8   :  { %v1157_v25 = vmul.f32 1.442695, %v1135_v20 }
 0x3c9   :  { %v1163_v21 = vmul.f32 1.442695, %v1138_v23  ;;  %v1116_v26 = vpop.xlane.xlu1 %1115 }
 0x3ca   :  { %3092 = vpow2.f32 %v1157_v25  ;;  %v1140_v31 = vsub.f32 %v3780_v6, %v1116_v26  ;;  %v1107_v27 = vpop.xlane.xlu0 %1106 }
 0x3cb   :  { %3094 = vpow2.f32 %v1163_v21  ;;  %v1137_v24 = vsub.f32 %v3776_v61, %v1107_v27 }
 0x3cc   :  { %v1167_v29 = vmul.f32 1.442695, %v1140_v31 }
 0x3cd   :  { %v3851_v32 = vpop.eup %3086  ;;  %v1161_v33 = vmul.f32 1.442695, %v1137_v24  ;;  %v1113_v36 = vpop.xlane.xlu1 %1112 }
 0x3ce   :  { %3096 = vpow2.f32 %v1167_v29  ;;  %v1139_v38 = vsub.f32 %v3786_v11, %v1113_v36  ;;  %v1122_v39 = vpop.xlane.xlu0 %1121  ;;  %v1192_v56 = vsel %vm1064_vm4, %v3851_v32, 0.0 }
 0x3cf   :  { %3098 = vpow2.f32 %v1161_v33  ;;  %v1142_v45 = vsub.f32 %v3794_v30, %v1122_v39  ;;  %1193 = vadd.xlane.f32.xlu0 %v1192_v56  ;;  %v3047_v33 = vunpack.i.h.bf16 %v3820_v47 }
 0x3d0   :  { %v3857_v6 = vpop.eup %3088  ;;  %v1165_v46 = vmul.f32 1.442695, %v1139_v38 }
 0x3d1   :  { %v3859_v61 = vpop.eup %3090  ;;  %v1171_v48 = vmul.f32 1.442695, %v1142_v45  ;;  %v1198_v42 = vsel %vm1064_vm4, %v3857_v6, 0.0 }
 0x3d2   :  { %3100 = vpow2.f32 %v1165_v46  ;;  %v1125_v49 = vpop.xlane.xlu1 %1124  ;;  %1199 = vadd.xlane.f32.xlu1 %v1198_v42  ;;  %v1119_v11 = vpop.xlane.xlu0 %1118  ;;  %v1189_v50 = vsel %vm1064_vm4, %v3859_v61, 0.0 }
 0x3d3   :  { %3102 = vpow2.f32 %v1171_v48  ;;  %v1143_v30 = vsub.f32 %v3806_v44, %v1125_v49  ;;  %v1141_v51 = vsub.f32 %v3800_v35, %v1119_v11  ;;  %1190 = vadd.xlane.f32.xlu0 %v1189_v50 }
 0x3d4   :  { %v3867_v53 = vpop.eup %3092 }
 0x3d5   :  { %v3869_v54 = vpop.eup %3094  ;;  %v1173_v57 = vmul.f32 1.442695, %v1143_v30  ;;  %v1169_v59 = vmul.f32 1.442695, %v1141_v51  ;;  %v1195_v62 = vsel %vm1064_vm4, %v3867_v53, 0.0 }
 0x3d6   :  { %1196 = vadd.xlane.f32.xlu1 %v1195_v62  ;;  %v1128_v37 = vpop.xlane.xlu0 %1127  ;;  %v1204_v63 = vsel %vm1064_vm4, %v3869_v54, 0.0  ;;  %v3055_v25 = vpop.permute.xlu1 %3054 }
 0x3d7   :  { %3104 = vpow2.f32 %v1173_v57  ;;  %v1144_v44 = vsub.f32 %v3804_v41, %v1128_v37  ;;  %1205 = vadd.xlane.f32.xlu0 %v1204_v63  ;;  %v3057_v45 = vunpack.i.h.bf16 %v3055_v25  ;;  %v3056_v46 = vunpack.i.l.bf16 %v3055_v25 }
 0x3d8   :  { %v3876_v35 = vpop.eup %3096  ;;  %3106 = vpow2.f32 %v1169_v59 }
 0x3d9   :  { %v3878_v52 = vpop.eup %3098  ;;  %v1175_v58 = vmul.f32 1.442695, %v1144_v44  ;;  %v1210_v60 = vsel %vm1064_vm4, %v3876_v35, 0.0 }
 0x3da   :  { %1211 = vadd.xlane.f32.xlu1 %v1210_v60  ;;  %v3050_v5 = vpop.permute.xlu0 %3049  ;;  %v1201_v7 = vsel %vm1064_vm4, %v3878_v52, 0.0 }
 0x3db   :  { %3108 = vpow2.f32 %v1175_v58  ;;  %v3052_v8 = vunpack.i.h.bf16 %v3050_v5  ;;  %v3051_v9 = vunpack.i.l.bf16 %v3050_v5  ;;  %1202 = vadd.xlane.f32.xlu0 %v1201_v7  ;;  %v3167_v7 = vld [vmem:[#allocation11 + $0x18] sm:$0xff] }
 0x3dc   :  { %v3884_v41 = vpop.eup %3100 }
 0x3dd   :  { %v3886_v10 = vpop.eup %3102  ;;  %v3888_v13 = vpack.c.bf16 %v3052_v8, %v3051_v9  ;;  %v1207_v14 = vsel %vm1064_vm4, %v3884_v41, 0.0 }
 0x3de   :  { %1208 = vadd.xlane.f32.xlu1 %v1207_v14  ;;  %v1216_v16 = vsel %vm1064_vm4, %v3886_v10, 0.0 }
 0x3df   :  { %1217 = vadd.xlane.f32.xlu0 %v1216_v16  ;;  %2930 = vmatprep.subr.bf16.mxu0 %v3888_v13 }
 0x3e1   :  { %v3895_v17 = vpop.eup %3104 }
 0x3e2   :  { %v3897_v18 = vpop.eup %3106  ;;  %v1219_v19 = vsel %vm1064_vm4, %v3895_v17, 0.0 }
 0x3e3   :  { %1220 = vadd.xlane.f32.xlu1 %v1219_v19  ;;  %v1213_v20 = vsel %vm1064_vm4, %v3897_v18, 0.0 }
 0x3e4   :  { %1214 = vadd.xlane.f32.xlu0 %v1213_v20 }
 0x3e5   :  { %v3903_v22 = vpop.eup %3108 }
 0x3e6   :  { %v1222_v23 = vsel %vm1064_vm4, %v3903_v22, 0.0 }
 0x3e8   :  { %1223 = vadd.xlane.f32.xlu0 %v1222_v23 }
 0x3f4   :  { %3064 = vrot.lane.b32.xlu1 %v3649_v43, %s3392_s11  ;;  %v3046_v43 = vunpack.i.l.bf16 %v3820_v47  ;;  %v2933_v47 = vpack.c.bf16 %v3057_v45, %v3056_v46 }
 0x3f6   :  { %v2925_v56 = vpack.c.bf16 %v3047_v33, %v3046_v43 }
 0x3fe   :  { %3059 = vrot.lane.b32.xlu0 %v3639_v40, %s3392_s11 }
 0x402   :  { %3069 = vrot.lane.b32.xlu0 %v3068_v3, %s3393_s13 }
 0x407   :  { %v1179_v21 = vpop.xlane.xlu1 %1178 }
 0x408   :  { %3110 = vrcp.f32 %v1179_v21 }
 0x40b   :  { %v1188_v26 = vpop.xlane.xlu1 %1187  ;;  %v1182_v31 = vpop.xlane.xlu0 %1181 }
 0x40c   :  { %3112 = vrcp.f32 %v1182_v31 }
 0x40d   :  { %3114 = vrcp.f32 %v1188_v26 }
 0x40f   :  { %v1185_v27 = vpop.xlane.xlu1 %1184 }
 0x410   :  { %3116 = vrcp.f32 %v1185_v27 }
 0x412   :  { %v3111_v24 = vpop.eup %3110 }
 0x413   :  { %v1241_v29 = vmul.f32 %v3111_v24, %v3828_v34 }
 0x415   :  { %2763 = vmatprep.mubr.msk.f32.mxu1 %vm1064_vm4, %v1241_v29 }
 0x416   :  { %v3113_v36 = vpop.eup %3112 }
 0x417   :  { %v1242_v40 = vmul.f32 %v3113_v36, %v3830_v2  ;;  %v3115_v38 = vpop.eup %3114 }
 0x418   :  { %v1244_v48 = vmul.f32 %v3115_v38, %v3834_v55 }
 0x419   :  { %2764 = vmatmul.mubr.msk.f32.vlgmr.msra.gmra.mrb[12].mxu1 %vm1064_vm4, %v1242_v40 }
 0x41a   :  { %v3117_v39 = vpop.eup %3116  ;;  %2920 = vmatpush3.bf16.msra.mxu1 %v3715_v28 }
 0x41b   :  { %v1243_v34 = vmul.f32 %v3117_v39, %v3840_v4  ;;  %2926 = vmatprep.subr.bf16.mxu1 %v2925_v56 }
 0x41d   :  { %2770 = vmatprep.mubr.msk.f32.mxu1 %vm1064_vm4, %v1243_v34 }
 0x41e   :  { %2771 = vmatmul.mubr.msk.f32.vlgmr.msra.gmra.mrb[14].mxu1 %vm1064_vm4, %v1244_v48 }
 0x41f   :  { %2928 = vmatpush3.bf16.msra.mxu1 %v2925_v56 }
 0x420   :  { %2934 = vmatprep.subr.bf16.mxu1 %v2933_v47 }
 0x45c   :  { %v1194_v2 = vpop.xlane.xlu0 %1193 }
 0x45d   :  { %3118 = vrcp.f32 %v1194_v2 }
 0x45f   :  { %v1200_v42 = vpop.xlane.xlu1 %1199 }
 0x460   :  { %v1191_v49 = vpop.xlane.xlu0 %1190 }
 0x461   :  { %3120 = vrcp.f32 %v1191_v49 }
 0x462   :  { %3122 = vrcp.f32 %v1200_v42 }
 0x463   :  { %v1197_v11 = vpop.xlane.xlu1 %1196 }
 0x464   :  { %3124 = vrcp.f32 %v1197_v11  ;;  %v1206_v28 = vpop.xlane.xlu0 %1205 }
 0x465   :  { %3126 = vrcp.f32 %v1206_v28 }
 0x467   :  { %v1212_v4 = vpop.xlane.xlu1 %1211  ;;  %v3119_v50 = vpop.eup %3118 }
 0x468   :  { %v1203_v55 = vpop.xlane.xlu0 %1202  ;;  %v1246_v37 = vmul.f32 %v3119_v50, %v3851_v32  ;;  %v3166_v32 = vld [vmem:[#allocation11 + $0x10] sm:$0xff] }
 0x469   :  { %3128 = vrcp.f32 %v1203_v55  ;;  %v3073_v8 = vpack.i.bf16 %v3167_v7, %v3166_v32 }
 0x46a   :  { %3130 = vrcp.f32 %v1212_v4 }
 0x46b   :  { %v3121_v30 = vpop.eup %3120  ;;  %v1209_v51 = vpop.xlane.xlu1 %1208  ;;  %3074 = vrot.lane.b32.xlu1 %v3073_v8, %s3393_s13 }
 0x46c   :  { %3132 = vrcp.f32 %v1209_v51  ;;  %v1218_v57 = vpop.xlane.xlu0 %1217  ;;  %v1245_v59 = vmul.f32 %v3121_v30, %v3859_v61  ;;  %v3123_v62 = vpop.eup %3122 }
 0x46d   :  { %v1248_v58 = vmul.f32 %v3123_v62, %v3857_v6 }
 0x46e   :  { %v3125_v63 = vpop.eup %3124  ;;  %2777 = vmatprep.mubr.msk.f32.mxu0 %vm1064_vm4, %v1245_v59 }
 0x46f   :  { %2778 = vmatmul.mubr.msk.f32.vlgmr.msra.gmra.mrb[8].mxu0 %vm1064_vm4, %v1246_v37  ;;  %v1247_v44 = vmul.f32 %v3125_v63, %v3867_v53  ;;  %v3127_v61 = vpop.eup %3126 }
 0x470   :  { %2932 = vmatpush3.bf16.msra.mxu0 %v3888_v13  ;;  %v1221_v60 = vpop.xlane.xlu1 %1220  ;;  %v1250_v14 = vmul.f32 %v3127_v61, %v3869_v54 }
 0x471   :  { %3134 = vrcp.f32 %v1221_v60  ;;  %v1215_v5 = vpop.xlane.xlu0 %1214  ;;  %2784 = vmatprep.mubr.msk.f32.mxu1 %vm1064_vm4, %v1247_v44 }
 0x472   :  { %3136 = vrcp.f32 %v1215_v5  ;;  %2785 = vmatmul.mubr.msk.f32.vlgmr.msra.gmra.mrb[16].mxu1 %vm1064_vm4, %v1248_v58 }
 0x473   :  { %v3129_v9 = vpop.eup %3128  ;;  %3138 = vrcp.f32 %v1218_v57  ;;  %2936 = vmatpush3.bf16.msra.mxu1 %v2933_v47 }
 0x474   :  { %v3065_v6 = vpop.permute.xlu1 %3064  ;;  %v1249_v53 = vmul.f32 %v3129_v9, %v3878_v52  ;;  %v3131_v13 = vpop.eup %3130 }
 0x475   :  { %v3067_v16 = vunpack.i.h.bf16 %v3065_v6  ;;  %v3066_v19 = vunpack.i.l.bf16 %v3065_v6  ;;  %v1224_v20 = vpop.xlane.xlu0 %1223  ;;  %v1252_v1 = vmul.f32 %v3131_v13, %v3876_v35 }
 0x476   :  { %v3133_v23 = vpop.eup %3132  ;;  %3140 = vrcp.f32 %v1224_v20  ;;  %2791 = vmatprep.mubr.msk.f32.mxu0 %vm1064_vm4, %v1249_v53 }
 0x477   :  { %v2941_v25 = vpack.c.bf16 %v3067_v16, %v3066_v19  ;;  %2792 = vmatmul.mubr.msk.f32.vlgmr.msra.gmra.mrb[10].mxu0 %vm1064_vm4, %v1250_v14  ;;  %v1251_v0 = vmul.f32 %v3133_v23, %v3884_v41 }
 0x479   :  { %v3060_v3 = vpop.permute.xlu0 %3059  ;;  %2798 = vmatprep.mubr.msk.f32.mxu1 %vm1064_vm4, %v1251_v0  ;;  %2942 = vmatprep.subr.bf16.mxu1 %v2941_v25 }
 0x47a   :  { %v3062_v52 = vunpack.i.h.bf16 %v3060_v3  ;;  %v3061_v54 = vunpack.i.l.bf16 %v3060_v3  ;;  %2799 = vmatmul.mubr.msk.f32.vlgmr.msra.gmra.mrb[18].mxu1 %vm1064_vm4, %v1252_v1  ;;  %v130_v1 = vld [vmem:[#allocation7 + $0x8] sm:$0xff] }
 0x47b   :  { %v3135_v21 = vpop.eup %3134  ;;  %2944 = vmatpush3.bf16.msra.mxu1 %v2941_v25 }
 0x47c   :  { %v3137_v26 = vpop.eup %3136  ;;  %v2937_v31 = vpack.c.bf16 %v3062_v52, %v3061_v54  ;;  %v1255_v27 = vmul.f32 %v3135_v21, %v3895_v17  ;;  %v129_v54 = vld [vmem:[#allocation7] sm:$0xff] }
 0x47d   :  { %v3139_v24 = vpop.eup %3138  ;;  %v1253_v29 = vmul.f32 %v3137_v26, %v3897_v18  ;;  %v3070_v43 = vpop.permute.xlu0 %3069 }
 0x47e   :  { %2938 = vmatprep.subr.bf16.mxu0 %v2937_v31  ;;  %2812 = vmatprep.mubr.msk.f32.mxu1 %vm1064_vm4, %v1255_v27  ;;  %v1254_v41 = vmul.f32 %v3139_v24, %v3886_v10  ;;  %v3072_v36 = vunpack.i.h.bf16 %v3070_v43  ;;  %v3071_v40 = vunpack.i.l.bf16 %v3070_v43  ;;  %v132_v24 = vld [vmem:[#allocation7 + $0x18] sm:$0xff] }
 0x47f   :  { %2940 = vmatpush3.bf16.msra.mxu0 %v2937_v31  ;;  %2805 = vmatprep.mubr.msk.f32.mxu0 %vm1064_vm4, %v1253_v29 }
 0x480   :  { %v3141_v35 = vpop.eup %3140  ;;  %v2945_v39 = vpack.c.bf16 %v3072_v36, %v3071_v40 }
 0x481   :  { %v1256_v33 = vmul.f32 %v3141_v35, %v3903_v22 }
 0x482   :  { %2806 = vmatmul.mubr.msk.f32.vlgmr.msra.gmra.mrb[12].mxu0 %vm1064_vm4, %v1254_v41  ;;  %2946 = vmatprep.subr.bf16.mxu0 %v2945_v39 }
 0x483   :  { %2813 = vmatmul.mubr.msk.f32.vlgmr.msra.gmra.mrb[20].mxu1 %vm1064_vm4, %v1256_v33  ;;  %2948 = vmatpush3.bf16.msra.mxu0 %v2945_v39  ;;  %v131_v33 = vld [vmem:[#allocation7 + $0x10] sm:$0xff] }
 0x4dd   :  { %v3075_v17 = vpop.permute.xlu1 %3074 }
 0x4de   :  { %v3077_v18 = vunpack.i.h.bf16 %v3075_v17  ;;  %v3076_v38 = vunpack.i.l.bf16 %v3075_v17 }
 0x4e0   :  { %v2949_v56 = vpack.c.bf16 %v3077_v18, %v3076_v38 }
 0x4e2   :  { %2950 = vmatprep.subr.bf16.mxu0 %v2949_v56 }
 0x4e3   :  { %2952 = vmatpush3.bf16.msra.mxu0 %v2949_v56 }
 0x4ec   :  { %v2765_v45 = vpop.f32.mrb[12].mxu1 }
 0x4ed   :  { %v1335_v46 = vpop.f32.mrb[13].mxu1 }
 0x4f1   :  { %v2772_v10 = vpop.f32.mrb[14].mxu1 }
 0x4f2   :  { %v1422_v22 = vpop.f32.mrb[15].mxu1 }
 0x542   :  { %v2779_v34 = vpop.f32.mrb[8].mxu0 }
 0x543   :  { %1959 = vrot.lane.b32.xlu1 %v2779_v34, %s3382_s22  ;;  %v1509_v48 = vpop.f32.mrb[9].mxu0 }
 0x544   :  { %1957 = vrot.lane.b32.xlu0 %v1509_v48, %s3382_s22 }
 0x545   :  { %v2786_v47 = vpop.f32.mrb[16].mxu1 }
 0x546   :  { %v1596_v2 = vpop.f32.mrb[17].mxu1 }
 0x547   :  { %1963 = vrot.lane.b32.xlu1 %v2786_v47, %s3382_s22 }
 0x548   :  { %1961 = vrot.lane.b32.xlu0 %v1596_v2, %s3382_s22 }
 0x54a   :  { %v2793_v42 = vpop.f32.mrb[10].mxu0 }
 0x54b   :  { %1975 = vrot.lane.b32.xlu1 %v2793_v42, %s3394_s1  ;;  %v1683_v49 = vpop.f32.mrb[11].mxu0 }
 0x54c   :  { %1973 = vrot.lane.b32.xlu0 %v1683_v49, %s3394_s1 }
 0x54d   :  { %v2800_v11 = vpop.f32.mrb[18].mxu1 }
 0x54e   :  { %v1770_v28 = vpop.f32.mrb[19].mxu1 }
 0x54f   :  { %1979 = vrot.lane.b32.xlu1 %v2800_v11, %s3394_s1 }
 0x550   :  { %1977 = vrot.lane.b32.xlu0 %v1770_v28, %s3394_s1 }
 0x555   :  { %v2807_v4 = vpop.f32.mrb[12].mxu0 }
 0x556   :  { %v2814_v55 = vpop.f32.mrb[20].mxu1  ;;  %1991 = vrot.lane.b32.xlu1 %v2807_v4, %s3395_s10  ;;  %v1857_v50 = vpop.f32.mrb[13].mxu0 }
 0x557   :  { %v1944_v30 = vpop.f32.mrb[21].mxu1  ;;  %1989 = vrot.lane.b32.xlu0 %v1857_v50, %s3395_s10 }
 0x55a   :  { %1995 = vrot.lane.b32.xlu1 %v2814_v55, %s3395_s10 }
 0x55b   :  { %1993 = vrot.lane.b32.xlu0 %v1944_v30, %s3395_s10 }
 0x55f   :  { %2031 = vrot.lane.b32.xlu0 %v3592_v15, %s3393_s13 }
 0x5b5   :  { %v1960_v51 = vpop.permute.xlu1 %1959 }
 0x5b6   :  { %v1958_v57 = vpop.permute.xlu0 %1957  ;;  %v2002_v61 = vsel %vm275_vm1, %v2765_v45, %v1960_v51 }
 0x5b7   :  { %v2001_v60 = vsel %vm275_vm1, %v1335_v46, %v1958_v57 }
 0x5b9   :  { %v1964_v59 = vpop.permute.xlu1 %1963 }
 0x5ba   :  { %v1962_v62 = vpop.permute.xlu0 %1961  ;;  %v2004_v13 = vsel %vm275_vm1, %v2772_v10, %v1964_v59  ;;  %v2190_v59 = vsub.s32 2, %v3586_v12 }
 0x5bb   :  { %v2003_v6 = vsel %vm275_vm1, %v1422_v22, %v1962_v62  ;;  %v3986_v62 = vld [vmem:[%s4070_s7] sm:$0xff]  ;;  %s3396_s7 = smov [#allocation15]  }
 0x5bc   :  { %s2514_s2 = sshll.u32 %s3396_s7, 4  ;;  %s2515_s2 = int_to_ptr.vmem [resolvable:$true] %s2514_s2 }
 0x5bd   :  { %v1976_v37 = vpop.permute.xlu1 %1975  ;;  %s3323_s15 = scalar_lea.vmem %s2515_s2, 2048  ;;  %p3328_p1 = scmp.lt.s32.totalorder %s2515_s2, %s2515_s2 }
 0x5be   :  { %v1974_v63 = vpop.permute.xlu0 %1973  ;;  %v2006_v8 = vsel %vm1064_vm4, %v2002_v61, %v1976_v37  ;;  %v3989_v37 = vrot.slane %v3986_v62, %v2190_v59  ;;  %p3324_p0 = scmp.ne.s32.totalorder %s2515_s2, %s3323_s15  ;;  %p3329_p2 = scmp.lt.s32.totalorder %s3323_s15, %s3323_s15 }
 0x5bf   :  { %v2005_v32 = vsel %vm1064_vm4, %v2001_v60, %v1974_v63  ;;  %v2207_v63 = vld [vmem:[#allocation13] sm:$0xff]  ;;  %v2209_v60 = vld [vmem:[#allocation13 + $0x10] sm:$0xff] }
 0x5c0   :  { %p3330_p3 = por %p3329_p2, %p3328_p1 }
 0x5c1   :  { %v1980_v44 = vpop.permute.xlu1 %1979 }
 0x5c2   :  { %v1978_v58 = vpop.permute.xlu0 %1977  ;;  %v2008_v19 = vsel %vm1064_vm4, %v2004_v13, %v1980_v44  ;;  %v2208_v44 = vld [vmem:[#allocation13 + $0x8] sm:$0xff]  ;;  %p3331_p4 = pnand %p3330_p3, %p3324_p0 }
 0x5c3   :  { %v2007_v14 = vsel %vm1064_vm4, %v2003_v6, %v1978_v58  ;;  %v2953_v58 = vpack.c.bf16 %v2208_v44, %v2207_v63 }
 0x5c5   :  { %2954 = vmatprep.subr.bf16.mxu1 %v2953_v58 }
 0x5c6   :  { %2956 = vmatpush3.bf16.msra.mxu1 %v2953_v58 }
 0x5c8   :  { %v1992_v5 = vpop.permute.xlu1 %1991 }
 0x5c9   :  { %v1990_v7 = vpop.permute.xlu0 %1989  ;;  %v2011_v9 = vsel %vm2009_vm7, %v2006_v8, %v1992_v5  ;;  %v2210_v5 = vld [vmem:[#allocation13 + $0x18] sm:$0xff] }
 0x5ca   :  { %v2010_v15 = vsel %vm2009_vm7, %v2005_v32, %v1990_v7  ;;  %v2957_v61 = vpack.c.bf16 %v2210_v5, %v2209_v60 }
 0x5cb   :  { %2823 = vmatprep.mubr.msk.f32.mxu0 %vm145_vm0, %v2010_v15 }
 0x5cc   :  { %v1996_v53 = vpop.permute.xlu1 %1995  ;;  %2824 = vmatmul.mubr.msk.f32.vlgmr.msra.gmra.mrb[14].mxu0 %vm145_vm0, %v2011_v9  ;;  %2958 = vmatprep.subr.bf16.mxu1 %v2957_v61 }
 0x5cd   :  { %v1994_v16 = vpop.permute.xlu0 %1993  ;;  %v2013_v23 = vsel %vm2009_vm7, %v2008_v19, %v1996_v53  ;;  %2960 = vmatpush3.bf16.msra.mxu1 %v2957_v61 }
 0x5ce   :  { %v2012_v20 = vsel %vm2009_vm7, %v2007_v14, %v1994_v16 }
 0x5cf   :  { %2826 = vmatprep.mubr.msk.f32.mxu0 %vm145_vm0, %v2012_v20 }
 0x5d0   :  { %2827 = vmatmul.mubr.msk.f32.gmra.mrb[16].mxu0 %vm145_vm0, %v2013_v23 }
 0x5d1   :  { %v2032_v25 = vpop.permute.xlu0 %2031 }
 0x69f   :  { %v2825_v0 = vpop.f32.mrb[14].mxu0 }
 0x6a0   :  { %v2112_v3 = vpop.f32.mrb[15].mxu0  ;;  %v2118_v52 = vadd.f32 %v2825_v0, %v2032_v25 }
 0x6a1   :  { %v2113_v21 = vadd.f32 %v2112_v3, %v2032_v25 }
 0x6a2   :  { %v2132_v26 = vadd.f32 %v2118_v52, %v130_v1 }
 0x6a3   :  { %v2828_v31 = vpop.f32.mrb[16].mxu0  ;;  %v2131_v27 = vadd.f32 %v2113_v21, %v129_v54 }
 0x6a4   :  { %v2128_v29 = vadd.f32 %v2828_v31, %v2032_v25  ;;  %v2122_v35 = vpop.f32.mrb[17].mxu0  ;;  %v2138_v41 = vsel %vm145_vm0, %v2132_v26, 0.0 }
 0x6a5   :  { %v2123_v43 = vadd.f32 %v2122_v35, %v2032_v25  ;;  %2139 = vadd.xlane.f32.xlu0 %v2138_v41  ;;  %v2135_v17 = vsel %vm145_vm0, %v2131_v27, 0.0 }
 0x6a6   :  { %2136 = vadd.xlane.f32.xlu1 %v2135_v17  ;;  %v2134_v36 = vadd.f32 %v2128_v29, %v132_v24 }
 0x6a7   :  { %v2133_v40 = vadd.f32 %v2123_v43, %v131_v33 }
 0x6a8   :  { %v2144_v18 = vsel %vm145_vm0, %v2134_v36, 0.0 }
 0x6a9   :  { %v2141_v38 = vsel %vm145_vm0, %v2133_v40, 0.0 }
 0x6aa   :  { %2142 = vadd.xlane.f32.xlu0 %v2141_v38  ;;  %2145 = vadd.xlane.f32.xlu1 %v2144_v18  ;;  %v2335_v38 = vld [vmem:[#allocation13 + $0x30] sm:$0xff] }
 0x732   :  { %v2140_v39 = vpop.xlane.xlu0 %2139 }
 0x733   :  { %v2149_v56 = vmul.f32 0.03125, %v2140_v39  ;;  %v2137_v45 = vpop.xlane.xlu1 %2136  ;;  %v2336_v39 = vld [vmem:[#allocation13 + $0x38] sm:$0xff] }
 0x734   :  { %v2148_v46 = vmul.f32 0.03125, %v2137_v45  ;;  %v2213_v45 = vsub.s32 1, %v3586_v12 }
 0x735   :  { %v2153_v10 = vsub.f32 %v2132_v26, %v2149_v56  ;;  %v2965_v56 = vpack.c.bf16 %v2336_v39, %v2335_v38 }
 0x736   :  { %v2152_v22 = vsub.f32 %v2131_v27, %v2148_v46  ;;  %v2214_v46 = vrot.slane %v3986_v62, %v2213_v45 }
 0x737   :  { %v2143_v34 = vpop.xlane.xlu0 %2142  ;;  %v2146_v48 = vpop.xlane.xlu1 %2145  ;;  %v2157_v47 = vmul.f32 %v2153_v10, %v2153_v10 }
 0x738   :  { %v2150_v2 = vmul.f32 0.03125, %v2143_v34  ;;  %v2151_v42 = vmul.f32 0.03125, %v2146_v48  ;;  %v2156_v49 = vmul.f32 %v2152_v22, %v2152_v22 }
 0x739   :  { %v2163_v11 = vsel %vm145_vm0, %v2157_v47, 0.0 }
 0x73a   :  { %v2154_v28 = vsub.f32 %v2133_v40, %v2150_v2  ;;  %v2155_v4 = vsub.f32 %v2134_v36, %v2151_v42  ;;  %2164 = vadd.xlane.f32.xlu1 %v2163_v11  ;;  %v2160_v55 = vsel %vm145_vm0, %v2156_v49, 0.0  ;;  %v2333_v36 = vld [vmem:[#allocation13 + $0x20] sm:$0xff]  ;;  %v2334_v40 = vld [vmem:[#allocation13 + $0x28] sm:$0xff] }
 0x73b   :  { %2161 = vadd.xlane.f32.xlu0 %v2160_v55  ;;  %v2961_v18 = vpack.c.bf16 %v2334_v40, %v2333_v36 }
 0x73c   :  { %v2158_v50 = vmul.f32 %v2154_v28, %v2154_v28  ;;  %v2159_v30 = vmul.f32 %v2155_v4, %v2155_v4 }
 0x73d   :  { %2962 = vmatprep.subr.bf16.mxu0 %v2961_v18 }
 0x73e   :  { %v2166_v51 = vsel %vm145_vm0, %v2158_v50, 0.0  ;;  %v2169_v57 = vsel %vm145_vm0, %v2159_v30, 0.0  ;;  %2964 = vmatpush3.bf16.xpose.msra.mxu0 %v2961_v18 }
 0x73f   :  { %2167 = vadd.xlane.f32.xlu0 %v2166_v51  ;;  %2170 = vadd.xlane.f32.xlu1 %v2169_v57 }
 0x740   :  { %2966 = vmatprep.subr.bf16.mxu0 %v2965_v56 }
 0x746   :  { %2968 = vmatpush3.bf16.xpose.msra.mxu0 %v2965_v56 }
 0x750   :  { %2200 = vrot.lane.b32.xlu1 %v3989_v37, %s3392_s11 }
 0x755   :  { %2193 = vrot.lane.b32.xlu0 %v3989_v37, %s3391_s30 }
 0x7c7   :  { %v2165_v32 = vpop.xlane.xlu1 %2164 }
 0x7c8   :  { %v2173_v7 = vmul.f32 0.03125, %v2165_v32  ;;  %v2162_v8 = vpop.xlane.xlu0 %2161 }
 0x7c9   :  { %v2172_v15 = vmul.f32 0.03125, %v2162_v8 }
 0x7ca   :  { %v2177_v9 = vadd.f32 1e-05, %v2173_v7 }
 0x7cb   :  { %v2176_v6 = vadd.f32 1e-05, %v2172_v15 }
 0x7cc   :  { %3142 = vrsqrt.f32 %v2177_v9  ;;  %v2168_v53 = vpop.xlane.xlu0 %2167  ;;  %v2171_v13 = vpop.xlane.xlu1 %2170 }
 0x7cd   :  { %3144 = vrsqrt.f32 %v2176_v6  ;;  %v2174_v14 = vmul.f32 0.03125, %v2168_v53  ;;  %v2175_v16 = vmul.f32 0.03125, %v2171_v13 }
 0x7cf   :  { %v2178_v19 = vadd.f32 1e-05, %v2174_v14  ;;  %v2179_v20 = vadd.f32 1e-05, %v2175_v16 }
 0x7d0   :  { %v2194_v25 = vpop.permute.xlu0 %2193  ;;  %v2201_v54 = vpop.permute.xlu1 %2200 }
 0x7d1   :  { %3146 = vrsqrt.f32 %v2178_v19 }
 0x7d2   :  { %3148 = vrsqrt.f32 %v2179_v20 }
 0x7d6   :  { %v3143_v23 = vpop.eup %3142 }
 0x7d7   :  { %v3145_v0 = vpop.eup %3144  ;;  %v2185_v1 = vmul.f32 %v3143_v23, %v2153_v10 }
 0x7d8   :  { %v2184_v3 = vmul.f32 %v3145_v0, %v2152_v22 }
 0x7d9   :  { %v2197_v52 = vmul.f32 %v2194_v25, %v2185_v1 }
 0x7da   :  { %v2196_v21 = vmul.f32 %v2194_v25, %v2184_v3 }
 0x7db   :  { %v3147_v26 = vpop.eup %3146  ;;  %v2204_v35 = vadd.f32 %v2201_v54, %v2197_v52 }
 0x7dc   :  { %v3149_v31 = vpop.eup %3148  ;;  %v2186_v27 = vmul.f32 %v3147_v26, %v2154_v28  ;;  %v3995_v24 = vadd.f32 %v2201_v54, %v2196_v21 }
 0x7dd   :  { %v2187_v29 = vmul.f32 %v3149_v31, %v2155_v4 }
 0x7de   :  { %v2198_v41 = vmul.f32 %v2194_v25, %v2186_v27  ;;  %2837 = vmatprep.mubr.msk.f32.mxu1 %vm145_vm0, %v3995_v24 }
 0x7df   :  { %v2199_v33 = vmul.f32 %v2194_v25, %v2187_v29  ;;  %2838 = vmatmul.mubr.msk.f32.vlgmr.msra.gmra.mrb[22].mxu1 %vm145_vm0, %v2204_v35 }
 0x7e0   :  { %v4000_v43 = vadd.f32 %v2201_v54, %v2198_v41 }
 0x7e1   :  { %v4002_v17 = vadd.f32 %v2201_v54, %v2199_v33 }
 0x7e2   :  { %2840 = vmatprep.mubr.msk.f32.mxu1 %vm145_vm0, %v4000_v43 }
 0x7e3   :  { %2841 = vmatmul.mubr.msk.f32.gmra.mrb[24].mxu1 %vm145_vm0, %v4002_v17 }
 0x8b2   :  { %v2839_v10 = vpop.f32.mrb[22].mxu1 }
 0x8b3   :  { %v2299_v22 = vadd.f32 %v2839_v10, %v2214_v46  ;;  %v2293_v34 = vpop.f32.mrb[23].mxu1 }
 0x8b4   :  { %v2294_v48 = vadd.f32 %v2293_v34, %v2214_v46 }
 0x8b5   :  { %v2317_v47 = vmul.f32 0.70710677, %v2299_v22  ;;  %v2313_v63 = vmul.f32 0.5, %v2299_v22 }
 0x8b6   :  { %v2316_v2 = vmul.f32 0.70710677, %v2294_v48  ;;  %v2842_v42 = vpop.f32.mrb[24].mxu1  ;;  %v2312_v57 = vmul.f32 0.5, %v2294_v48 }
 0x8b7   :  { %3150 = verf.f32 %v2317_v47  ;;  %v2309_v49 = vadd.f32 %v2842_v42, %v2214_v46  ;;  %v2303_v11 = vpop.f32.mrb[25].mxu1 }
 0x8b8   :  { %3152 = verf.f32 %v2316_v2  ;;  %v2304_v28 = vadd.f32 %v2303_v11, %v2214_v46 }
 0x8b9   :  { %v2319_v4 = vmul.f32 0.70710677, %v2309_v49  ;;  %v2315_v8 = vmul.f32 0.5, %v2309_v49 }
 0x8ba   :  { %v2318_v55 = vmul.f32 0.70710677, %v2304_v28  ;;  %v2314_v32 = vmul.f32 0.5, %v2304_v28 }
 0x8bb   :  { %3154 = verf.f32 %v2319_v4 }
 0x8bc   :  { %3156 = verf.f32 %v2318_v55 }
 0x8c1   :  { %v3151_v50 = vpop.eup %3150 }
 0x8c2   :  { %v3153_v30 = vpop.eup %3152  ;;  %v2325_v51 = vadd.f32 1.0, %v3151_v50 }
 0x8c3   :  { %v2324_v59 = vadd.f32 1.0, %v3153_v30 }
 0x8c4   :  { %v2329_v5 = vmul.f32 %v2325_v51, %v2313_v63 }
 0x8c5   :  { %v3155_v44 = vpop.eup %3154  ;;  %v2328_v58 = vmul.f32 %v2324_v59, %v2312_v57 }
 0x8c6   :  { %v3157_v60 = vpop.eup %3156  ;;  %v2327_v61 = vadd.f32 1.0, %v3155_v44 }
 0x8c7   :  { %v2326_v7 = vadd.f32 1.0, %v3157_v60  ;;  %2851 = vmatprep.mubr.f32.mxu0 %v2328_v58 }
 0x8c8   :  { %2852 = vmatmul.mubr.f32.vlgmr.msra.gmra.mrb[18].mxu0 %v2329_v5  ;;  %v2331_v9 = vmul.f32 %v2327_v61, %v2315_v8 }
 0x8c9   :  { %v2330_v15 = vmul.f32 %v2326_v7, %v2314_v32 }
 0x8cb   :  { %2854 = vmatprep.mubr.f32.mxu0 %v2330_v15 }
 0x8cc   :  { %2855 = vmatmul.mubr.f32.gmra.mrb[20].mxu0 %v2331_v9 }
 0x99b   :  { %v2853_v6 = vpop.f32.mrb[18].mxu0 }
 0x99c   :  { %v2409_v53 = vadd.f32 %v2853_v6, %v3989_v37  ;;  %v2403_v13 = vpop.f32.mrb[19].mxu0 }
 0x99d   :  { %v2404_v14 = vadd.f32 %v2403_v13, %v3989_v37 }
 0x99e   :  { %v2423_v16 = vadd.f32 %v2409_v53, %v2204_v35 }
 0x99f   :  { %v2856_v19 = vpop.f32.mrb[20].mxu0  ;;  %v2422_v20 = vadd.f32 %v2404_v14, %v3995_v24 }
 0x9a0   :  { %v2419_v23 = vadd.f32 %v2856_v19, %v3989_v37  ;;  %v2413_v25 = vpop.f32.mrb[21].mxu0  ;;  %v2429_v0 = vsel %vm145_vm0, %v2423_v16, 0.0 }
 0x9a1   :  { %v2414_v1 = vadd.f32 %v2413_v25, %v3989_v37  ;;  %2430 = vadd.xlane.f32.xlu0 %v2429_v0  ;;  %v2426_v3 = vsel %vm145_vm0, %v2422_v20, 0.0 }
 0x9a2   :  { %2427 = vadd.xlane.f32.xlu1 %v2426_v3  ;;  %v2425_v52 = vadd.f32 %v2419_v23, %v4002_v17 }
 0x9a3   :  { %v2424_v54 = vadd.f32 %v2414_v1, %v4000_v43 }
 0x9a4   :  { %v2435_v21 = vsel %vm145_vm0, %v2425_v52, 0.0 }
 0x9a5   :  { %v2432_v26 = vsel %vm145_vm0, %v2424_v54, 0.0 }
 0x9a6   :  { %2433 = vadd.xlane.f32.xlu0 %v2432_v26  ;;  %2436 = vadd.xlane.f32.xlu1 %v2435_v21 }
 0xa2e   :  { %v2431_v31 = vpop.xlane.xlu0 %2430 }
 0xa2f   :  { %v2439_v27 = vmul.f32 0.03125, %v2431_v31  ;;  %v2428_v24 = vpop.xlane.xlu1 %2427 }
 0xa30   :  { %v2438_v29 = vmul.f32 0.03125, %v2428_v24 }
 0xa31   :  { %v2443_v35 = vsub.f32 %v2423_v16, %v2439_v27 }
 0xa32   :  { %v2442_v41 = vsub.f32 %v2422_v20, %v2438_v29 }
 0xa33   :  { %v2434_v33 = vpop.xlane.xlu0 %2433  ;;  %v2437_v36 = vpop.xlane.xlu1 %2436  ;;  %v2447_v40 = vmul.f32 %v2443_v35, %v2443_v35 }
 0xa34   :  { %v2440_v18 = vmul.f32 0.03125, %v2434_v33  ;;  %v2441_v38 = vmul.f32 0.03125, %v2437_v36  ;;  %v2446_v17 = vmul.f32 %v2442_v41, %v2442_v41 }
 0xa35   :  { %v2453_v43 = vsel %vm145_vm0, %v2447_v40, 0.0 }
 0xa36   :  { %v2444_v39 = vsub.f32 %v2424_v54, %v2440_v18  ;;  %v2445_v56 = vsub.f32 %v2425_v52, %v2441_v38  ;;  %2454 = vadd.xlane.f32.xlu1 %v2453_v43  ;;  %v2450_v45 = vsel %vm145_vm0, %v2446_v17, 0.0 }
 0xa37   :  { %2451 = vadd.xlane.f32.xlu0 %v2450_v45 }
 0xa38   :  { %v2448_v46 = vmul.f32 %v2444_v39, %v2444_v39  ;;  %v2449_v10 = vmul.f32 %v2445_v56, %v2445_v56 }
 0xa3a   :  { %v2456_v22 = vsel %vm145_vm0, %v2448_v46, 0.0  ;;  %v2459_v34 = vsel %vm145_vm0, %v2449_v10, 0.0 }
 0xa3b   :  { %2457 = vadd.xlane.f32.xlu0 %v2456_v22  ;;  %2460 = vadd.xlane.f32.xlu1 %v2459_v34 }
 0xa51   :  { %2478 = vrot.lane.b32.xlu0 %v3989_v37, %s3393_s13 }
 0xa52   :  { %3334 = shalt.err (!%p3331_p4)
}
 0xa53   :  { %s3335_s19 = scalar_lea.hbm %s4072_s9, 2048 }
 0xa54   :  { %p3336_p5 = scmp.ne.s32.totalorder %s4072_s9, %s3335_s19  ;;  %p3339_p6 = scmp.lt.u32.totalorder %s3335_s19, %s4072_s9 }
 0xa56   :  { %p3341_p7 = pnand %p3339_p6, %p3336_p5 }
 0xa58   :  { %3344 = shalt.err (!%p3341_p7)
}
 0xa59   :  { %2520 = dma.vmem_to_hbm [thread:$0]  %s2515_s2, 2048, %s4072_s9, [#allocation16], %s3381_s21, %s3381_s21, %s3382_s22   ;;  %v2487_v51 = vsub.s32 3, %v3586_v12 }
 0xa5a   :  { %s3397_s9 = smov [#allocation14]  }
 0xa5b   :  { %v2488_v44 = vrot.slane %v3986_v62, %v2487_v51  ;;  %s2502_s27 = sshll.u32 %s3397_s9, 4  ;;  %s2503_s27 = int_to_ptr.vmem [resolvable:$true] %s2502_s27 }
 0xa5c   :  { %s3345_s4 = scalar_lea.vmem %s2503_s27, 512  ;;  %p3350_p9 = scmp.lt.s32.totalorder %s2503_s27, %s2503_s27 }
 0xa5d   :  { %p3346_p8 = scmp.ne.s32.totalorder %s2503_s27, %s3345_s4  ;;  %p3351_p10 = scmp.lt.s32.totalorder %s3345_s4, %s3345_s4 }
 0xa5f   :  { %p3352_p11 = por %p3351_p10, %p3350_p9 }
 0xa61   :  { %p3353_p12 = pnand %p3352_p11, %p3346_p8 }
 0xac3   :  { %v2455_v37 = vpop.xlane.xlu1 %2454 }
 0xac4   :  { %v2463_v48 = vmul.f32 0.03125, %v2455_v37  ;;  %v2452_v47 = vpop.xlane.xlu0 %2451 }
 0xac5   :  { %v2462_v2 = vmul.f32 0.03125, %v2452_v47 }
 0xac6   :  { %v2467_v42 = vadd.f32 1e-05, %v2463_v48 }
 0xac7   :  { %v2466_v49 = vadd.f32 1e-05, %v2462_v2 }
 0xac8   :  { %3158 = vrsqrt.f32 %v2467_v42  ;;  %v2458_v11 = vpop.xlane.xlu0 %2457  ;;  %v2461_v28 = vpop.xlane.xlu1 %2460 }
 0xac9   :  { %3160 = vrsqrt.f32 %v2466_v49  ;;  %v2464_v4 = vmul.f32 0.03125, %v2458_v11  ;;  %v2465_v55 = vmul.f32 0.03125, %v2461_v28 }
 0xacb   :  { %v2468_v50 = vadd.f32 1e-05, %v2464_v4  ;;  %v2469_v30 = vadd.f32 1e-05, %v2465_v55 }
 0xacc   :  { %v2479_v59 = vpop.permute.xlu0 %2478 }
 0xacd   :  { %3162 = vrsqrt.f32 %v2468_v50 }
 0xace   :  { %3164 = vrsqrt.f32 %v2469_v30 }
 0xad2   :  { %v3159_v57 = vpop.eup %3158 }
 0xad3   :  { %v3161_v63 = vpop.eup %3160  ;;  %v2475_v58 = vmul.f32 %v3159_v57, %v2443_v35 }
 0xad4   :  { %v2474_v60 = vmul.f32 %v3161_v63, %v2442_v41 }
 0xad5   :  { %v2482_v5 = vmul.f32 %v2479_v59, %v2475_v58 }
 0xad6   :  { %v2481_v61 = vmul.f32 %v2479_v59, %v2474_v60 }
 0xad7   :  { %v3163_v32 = vpop.eup %3162  ;;  %v2490_v7 = vadd.f32 %v2488_v44, %v2482_v5 }
 0xad8   :  { %v3165_v8 = vpop.eup %3164  ;;  %v2476_v15 = vmul.f32 %v3163_v32, %v2444_v39  ;;  %v2489_v9 = vadd.f32 %v2488_v44, %v2481_v61 }
 0xad9   :  { %v2477_v6 = vmul.f32 %v3165_v8, %v2445_v56  ;;  %2494 = vst.msk [vmem:[#allocation14 + $0x8] sm:$0xff] %vm145_vm0, %v2490_v7 }
 0xada   :  { %v2483_v53 = vmul.f32 %v2479_v59, %v2476_v15  ;;  %2493 = vst.msk [vmem:[#allocation14] sm:$0xff] %vm145_vm0, %v2489_v9 }
 0xadb   :  { %v2484_v12 = vmul.f32 %v2479_v59, %v2477_v6 }
 0xadc   :  { %v2491_v13 = vadd.f32 %v2488_v44, %v2483_v53 }
 0xadd   :  { %v2492_v62 = vadd.f32 %v2488_v44, %v2484_v12 }
 0xade   :  { %2495 = vst.msk [vmem:[#allocation14 + $0x10] sm:$0xff] %vm145_vm0, %v2491_v13 }
 0xadf   :  { %2496 = vst.msk [vmem:[#allocation14 + $0x18] sm:$0xff] %vm145_vm0, %v2492_v62 }
 0xae0   :  { %3356 = shalt.err (!%p3353_p12)
}
 0xae1   :  { %s3357_s0 = scalar_lea.hbm %s4071_s8, 512 }
 0xae2   :  { %p3358_p13 = scmp.ne.s32.totalorder %s4071_s8, %s3357_s0  ;;  %p3361_p0 = scmp.lt.u32.totalorder %s3357_s0, %s4071_s8 }
 0xae4   :  { %p3363_p1 = pnand %p3361_p0, %p3358_p13 }
 0xae6   :  { %3366 = shalt.err (!%p3363_p1)
}
 0xae7   :  { %2508 = dma.vmem_to_hbm [thread:$0]  %s2503_s27, 512, %s4071_s8, [#allocation4], %s3381_s21, %s3381_s21, %s3382_s22  }
 0xae8   :  { %3375 = dma.done.wait [#allocation4], 512  }
 0xae9   :  { %3376 = vsyncadd [#allocation4], 4294966784 }
 0xaea   :  { %3377 = dma.done.wait [#allocation16], 2048  }
 0xaeb   :  { %3378 = vsyncadd [#allocation16], 4294965248 }
 0xaec   :  { %2527 = vsyncpa [#allocation3], 1 }
 0xaed   :  { %2528 = vsyncpa [#allocation6], 1 }
 0xaee   :  { %2529 = vsyncpa [#allocation9], 1 }
 0xaef   :  { %2530 = vsyncpa [#allocation12], 1 }
 0xaf0   :  { %2531 = vsyncpa [#allocation4], 1 }
 0xaf1   :  { %2532 = vsyncpa [#allocation16], 1 }

</bundles_post_ra>
